<compile_context>
chip_gen: v5e
topology: v5e:2x2
jax: 0.10.0
libtpu: 0.0.40
codegen_flags: <defaults>
</compile_context>

<pallas_src>
import jax
import jax.numpy as jnp
from jax.experimental import pallas as pl
from jax.experimental.pallas import tpu as pltpu  # noqa: F401  (default whole-array-in-VMEM specs used)

# ----- scaled-down config (MiniLMv2-L6-H384 -> tiny synthetic encoder) -----
B = 2            # batch (per member of the a/b pair)
S = 8            # sequence length
H = 32           # hidden size
NH = 2           # attention heads
HD = H // NH     # head dim
I = 64           # FFN intermediate size
L = 2            # encoder layers
VOCAB = 100      # valid token ids
VOCAB_PAD = 128  # lane-aligned embedding-table rows (rows >= VOCAB unused)
LN_EPS = 1e-5
NPAIR = 2        # the (a, b) pair
PB = NPAIR * B   # pair folded into the batch dimension
TT = PB * S      # total token rows


def _layer_norm(x, gamma, beta):
    mu = jnp.mean(x, axis=-1, keepdims=True)
    var = jnp.mean((x - mu) ** 2, axis=-1, keepdims=True)
    return (x - mu) * jax.lax.rsqrt(var + LN_EPS) * gamma + beta


def _bf16(x):
    return x.astype(jnp.bfloat16)


# ------------------------------ fused kernel --------------------------------

def fused_forward_kernel(ids_a_ref, ids_b_ref, mask_a_ref, mask_b_ref,
                         wemb_ref, post_ref, eg_ref, eb_ref,
                         wqkv_ref, bqkv_ref, wo_ref, bo_ref,
                         ln1g_ref, ln1b_ref,
                         w1_ref, b1_ref, w2_ref, b2_ref,
                         ln2g_ref, ln2b_ref,
                         fcw_ref, fcb_ref, o_ref):
    """Whole forward for BOTH members of the pair (folded into the batch dim).

    ids_*_ref:  (B*S, 1) int32 token ids
    mask_*_ref: (B, S)   int32 attention mask (1 = keep, 0 = pad)
    wemb_ref:   (VOCAB_PAD, H) bf16 word-embedding table
    post_ref:   (S, H)   f32   pos + token-type embedding (pre-summed)
    o_ref:      (PB, 1)  f32   CLS scores, rows [a_b0, a_b1, b_b0, b_b1]
    Per-layer weights are stacked along a leading L axis (static-unrolled).
    """
    # ---- embedding gather as a one-hot matmul (no XLA gather outside) ------
    ids = jnp.concatenate([ids_a_ref[...], ids_b_ref[...]], axis=0)        # (TT, 1)
    vocab_iota = jax.lax.broadcasted_iota(jnp.int32, (TT, VOCAB_PAD), 1)
    onehot = jnp.where(ids == vocab_iota, 1.0, 0.0).astype(jnp.bfloat16)   # (TT, VP)
    word = jnp.dot(onehot, wemb_ref[...],
                   preferred_element_type=jnp.float32)                     # (TT, H)
    x = word.reshape(PB, S, H) + post_ref[...]          # + positional + type emb
    x = _layer_norm(x.reshape(TT, H), eg_ref[...], eb_ref[...])

    # ---- additive attention-mask bias, materialized ONCE before the loop ----
    mask = jnp.concatenate([mask_a_ref[...], mask_b_ref[...]],
                           axis=0).astype(jnp.float32)                     # (PB, S)
    bias = jnp.broadcast_to(((1.0 - mask) * -1e9)[:, None, :], (PB, S, S))

    for l in range(L):                       # static layer loop (unrolled)
        # -------------- self-attention: fused QKV projection -----------------
        # 1/sqrt(HD) is pre-folded into the Q columns of wqkv (init time).
        qkv = (jnp.dot(_bf16(x), wqkv_ref[l],
                       preferred_element_type=jnp.float32) + bqkv_ref[l])  # (TT, 3H)
        qkv_bf = _bf16(qkv)                  # single cast, reused by all heads

        ctx_heads = []
        for h in range(NH):                  # static head loop
            qh = qkv_bf[:, h * HD:(h + 1) * HD].reshape(PB, S, HD)
            kh = qkv_bf[:, H + h * HD:H + (h + 1) * HD].reshape(PB, S, HD)
            vh = qkv_bf[:, 2 * H + h * HD:2 * H + (h + 1) * HD].reshape(PB, S, HD)
            s = jnp.einsum('pqd,pkd->pqk', qh, kh,
                           preferred_element_type=jnp.float32) + bias
            s = s - jnp.max(s, axis=-1, keepdims=True)
            p = jnp.exp(s)
            p = p * pl.reciprocal(jnp.sum(p, axis=-1, keepdims=True), approx=True)
            ctx_heads.append(
                jnp.einsum('pqk,pkd->pqd', _bf16(p), vh,
                           preferred_element_type=jnp.float32).reshape(TT, HD))

        # single output projection on the concatenated per-head contexts
        ctx = jnp.concatenate(ctx_heads, axis=-1)                          # (TT, H)
        attn = (jnp.dot(_bf16(ctx), wo_ref[l],
                        preferred_element_type=jnp.float32) + bo_ref[l])
        x = _layer_norm(x + attn, ln1g_ref[l], ln1b_ref[l])

        # ------------------------------ feed-forward --------------------------
        h1 = (jnp.dot(_bf16(x), w1_ref[l],
                      preferred_element_type=jnp.float32) + b1_ref[l])
        # TODO(synk): HF RoBERTa uses exact erf-GELU; tanh approximation used
        # here since erf has no direct Mosaic lowering.
        h1 = jax.nn.gelu(h1)
        y = (jnp.dot(_bf16(h1), w2_ref[l],
                     preferred_element_type=jnp.float32) + b2_ref[l])
        x = _layer_norm(x + y, ln2g_ref[l], ln2b_ref[l])

    # CLS pooling + Linear(H -> 1) as a lane reduction (no N=1 MXU pass)
    cls = x.reshape(PB, S, H)[:, 0, :]                                     # (PB, H)
    o_ref[...] = (jnp.sum(cls * fcw_ref[...], axis=-1, keepdims=True)
                  + fcb_ref[...])


# ------------------------- parameters (synthetic) ---------------------------

def _normal(key, shape, scale=0.02):
    return (scale * jax.random.normal(key, shape)).astype(jnp.float32)


def init_params(seed=0):
    keys = iter(jax.random.split(jax.random.PRNGKey(seed), 32))

    # fold the 1/sqrt(HD) attention scale into the Q columns of wqkv
    wqkv = _normal(next(keys), (L, H, 3 * H))
    wqkv = wqkv.at[:, :, :H].multiply(1.0 / (HD ** 0.5))

    pos_emb = _normal(next(keys), (S, H))
    type_emb = _normal(next(keys), (1, H))

    return {
        # bf16 weight matrices (MXU-native, half the DMA bytes)
        'word_emb': _bf16(_normal(next(keys), (VOCAB_PAD, H))),
        'wqkv': _bf16(wqkv),
        'wo': _bf16(_normal(next(keys), (L, H, H))),
        'w1': _bf16(_normal(next(keys), (L, H, I))),
        'w2': _bf16(_normal(next(keys), (L, I, H))),
        # f32 vectors / biases / norms
        'pos_type_emb': pos_emb + type_emb,          # (S, H), pre-summed
        'emb_ln_g': jnp.ones((1, H), jnp.float32),
        'emb_ln_b': jnp.zeros((1, H), jnp.float32),
        'bqkv': jnp.zeros((L, 1, 3 * H), jnp.float32),
        'bo': jnp.zeros((L, 1, H), jnp.float32),
        'ln1_g': jnp.ones((L, 1, H), jnp.float32),
        'ln1_b': jnp.zeros((L, 1, H), jnp.float32),
        'b1': jnp.zeros((L, 1, I), jnp.float32),
        'b2': jnp.zeros((L, 1, H), jnp.float32),
        'ln2_g': jnp.ones((L, 1, H), jnp.float32),
        'ln2_b': jnp.zeros((L, 1, H), jnp.float32),
        'fc_w': _normal(next(keys), (1, H)),
        'fc_b': jnp.zeros((1, 1), jnp.float32),
    }


# ------------------------------ forward pass --------------------------------

def forward(params, input_ids_a, attention_mask_a, input_ids_b, attention_mask_b):
    # Only metadata-level reshapes outside the kernel; the gather, mask bias,
    # pair stacking and the whole encoder run inside ONE pallas_call.
    ids_a = input_ids_a.astype(jnp.int32).reshape(B * S, 1)
    ids_b = input_ids_b.astype(jnp.int32).reshape(B * S, 1)

    args = (ids_a, ids_b,
            attention_mask_a.astype(jnp.int32), attention_mask_b.astype(jnp.int32),
            params['word_emb'], params['pos_type_emb'],
            params['emb_ln_g'], params['emb_ln_b'],
            params['wqkv'], params['bqkv'], params['wo'], params['bo'],
            params['ln1_g'], params['ln1_b'],
            params['w1'], params['b1'], params['w2'], params['b2'],
            params['ln2_g'], params['ln2_b'],
            params['fc_w'], params['fc_b'])

    # No grid: every operand is a whole-array VMEM block, single kernel step,
    # no per-grid-step overhead and no double-buffering of resident weights.
    scores = pl.pallas_call(
        fused_forward_kernel,
        out_shape=jax.ShapeDtypeStruct((PB, 1), jnp.float32),
    )(*args)

    return scores[:B, 0], scores[B:, 0]                   # each (B,)


# ---------------------------------- main -------------------------------------

if __name__ == "__main__":
    params = init_params(0)

    key = jax.random.PRNGKey(0)
    ka, kb = jax.random.split(key)
    input_ids_a = jax.random.randint(ka, (B, S), 0, VOCAB, dtype=jnp.int32)
    input_ids_b = jax.random.randint(kb, (B, S), 0, VOCAB, dtype=jnp.int32)
    attention_mask_a = jnp.ones((B, S), jnp.int32)
    attention_mask_b = jnp.ones((B, S), jnp.int32).at[:, S - 2:].set(0)

    score_a, score_b = jax.jit(forward)(
        params, input_ids_a, attention_mask_a, input_ids_b, attention_mask_b)
    jax.block_until_ready((score_a, score_b))

    assert score_a.shape == (B,) and score_b.shape == (B,)
    assert bool(jnp.all(jnp.isfinite(score_a)))
    assert bool(jnp.all(jnp.isfinite(score_b)))
    print("KERNEL_OK")
</pallas_src>

<mosaic_0001>
module attributes {stable_mosaic.version = 11 : i64} {
  func.func @fused_forward_kernel(%arg0: memref<16x1xi32, #tpu.memory_space<vmem>>, %arg1: memref<16x1xi32, #tpu.memory_space<vmem>>, %arg2: memref<2x8xi32, #tpu.memory_space<vmem>>, %arg3: memref<2x8xi32, #tpu.memory_space<vmem>>, %arg4: memref<128x32xbf16, #tpu.memory_space<vmem>>, %arg5: memref<8x32xf32, #tpu.memory_space<vmem>>, %arg6: memref<1x32xf32, #tpu.memory_space<vmem>>, %arg7: memref<1x32xf32, #tpu.memory_space<vmem>>, %arg8: memref<2x32x96xbf16, #tpu.memory_space<vmem>>, %arg9: memref<2x1x96xf32, #tpu.memory_space<vmem>>, %arg10: memref<2x32x32xbf16, #tpu.memory_space<vmem>>, %arg11: memref<2x1x32xf32, #tpu.memory_space<vmem>>, %arg12: memref<2x1x32xf32, #tpu.memory_space<vmem>>, %arg13: memref<2x1x32xf32, #tpu.memory_space<vmem>>, %arg14: memref<2x32x64xbf16, #tpu.memory_space<vmem>>, %arg15: memref<2x1x64xf32, #tpu.memory_space<vmem>>, %arg16: memref<2x64x32xbf16, #tpu.memory_space<vmem>>, %arg17: memref<2x1x32xf32, #tpu.memory_space<vmem>>, %arg18: memref<2x1x32xf32, #tpu.memory_space<vmem>>, %arg19: memref<2x1x32xf32, #tpu.memory_space<vmem>>, %arg20: memref<1x32xf32, #tpu.memory_space<vmem>>, %arg21: memref<1x1xf32, #tpu.memory_space<vmem>>, %arg22: memref<4x1xf32, #tpu.memory_space<vmem>>) attributes {dimension_semantics = [], scalar_prefetch = 0 : i64, scratch_operands = 0 : i64, tpu.core_type = #tpu.core_type<tc>} {
    %c0 = arith.constant 0 : index
    %c0_0 = arith.constant 0 : index
    %0 = vector.load %arg0[%c0, %c0_0] : memref<16x1xi32, #tpu.memory_space<vmem>>, vector<16x1xi32>
    %c0_1 = arith.constant 0 : index
    %c0_2 = arith.constant 0 : index
    %1 = vector.load %arg1[%c0_1, %c0_2] : memref<16x1xi32, #tpu.memory_space<vmem>>, vector<16x1xi32>
    %2 = tpu.concatenate %0, %1 in 0 : vector<16x1xi32>, vector<16x1xi32> -> vector<32x1xi32>
    %3 = tpu.iota {dimensions = array<i32: 1>} : vector<32x128xi32>
    %4 = vector.broadcast %2 : vector<32x1xi32> to vector<32x128xi32>
    %5 = arith.cmpi eq, %4, %3 : vector<32x128xi32>
    %cst = arith.constant 1.000000e+00 : f32
    %cst_3 = arith.constant 0.000000e+00 : f32
    %6 = vector.broadcast %cst : f32 to vector<32x128xf32>
    %7 = vector.broadcast %cst_3 : f32 to vector<32x128xf32>
    %8 = arith.select %5, %6, %7 : vector<32x128xi1>, vector<32x128xf32>
    %9 = arith.truncf %8 : vector<32x128xf32> to vector<32x128xbf16>
    %c0_4 = arith.constant 0 : index
    %c0_5 = arith.constant 0 : index
    %10 = vector.load %arg4[%c0_4, %c0_5] : memref<128x32xbf16, #tpu.memory_space<vmem>>, vector<128x32xbf16>
    %cst_6 = arith.constant dense<0.000000e+00> : vector<32x32xf32>
    %11 = tpu.matmul %9, %10, %cst_6 {dimension_numbers = #tpu.dot_dimension_numbers<[1], [0], [0], [1], [0, 0, 1, 1], [], []>} : vector<32x128xbf16>, vector<128x32xbf16>, vector<32x32xf32> -> vector<32x32xf32>
    %12 = vector.shape_cast %11 : vector<32x32xf32> to vector<4x8x32xf32>
    %c0_7 = arith.constant 0 : index
    %c0_8 = arith.constant 0 : index
    %13 = vector.load %arg5[%c0_7, %c0_8] : memref<8x32xf32, #tpu.memory_space<vmem>>, vector<8x32xf32>
    %14 = vector.shape_cast %13 : vector<8x32xf32> to vector<1x8x32xf32>
    %15 = vector.broadcast %14 : vector<1x8x32xf32> to vector<4x8x32xf32>
    %16 = arith.addf %12, %15 : vector<4x8x32xf32>
    %17 = vector.shape_cast %16 : vector<4x8x32xf32> to vector<32x32xf32>
    %c0_9 = arith.constant 0 : index
    %c0_10 = arith.constant 0 : index
    %18 = vector.load %arg6[%c0_9, %c0_10] : memref<1x32xf32, #tpu.memory_space<vmem>>, vector<1x32xf32>
    %c0_11 = arith.constant 0 : index
    %c0_12 = arith.constant 0 : index
    %19 = vector.load %arg7[%c0_11, %c0_12] : memref<1x32xf32, #tpu.memory_space<vmem>>, vector<1x32xf32>
    %cst_13 = arith.constant dense<0.000000e+00> : vector<32xf32>
    %20 = vector.multi_reduction <add>, %17, %cst_13 [1] : vector<32x32xf32> to vector<32xf32>
    %21 = vector.shape_cast %20 : vector<32xf32> to vector<32x1xf32>
    %cst_14 = arith.constant 3.200000e+01 : f32
    %22 = vector.broadcast %cst_14 : f32 to vector<32x1xf32>
    %23 = arith.divf %21, %22 : vector<32x1xf32>
    %24 = vector.broadcast %23 : vector<32x1xf32> to vector<32x32xf32>
    %25 = arith.subf %17, %24 : vector<32x32xf32>
    %26 = arith.mulf %25, %25 : vector<32x32xf32>
    %cst_15 = arith.constant dense<0.000000e+00> : vector<32xf32>
    %27 = vector.multi_reduction <add>, %26, %cst_15 [1] : vector<32x32xf32> to vector<32xf32>
    %28 = vector.shape_cast %27 : vector<32xf32> to vector<32x1xf32>
    %cst_16 = arith.constant 3.200000e+01 : f32
    %29 = vector.broadcast %cst_16 : f32 to vector<32x1xf32>
    %30 = arith.divf %28, %29 : vector<32x1xf32>
    %31 = vector.broadcast %23 : vector<32x1xf32> to vector<32x32xf32>
    %32 = arith.subf %17, %31 : vector<32x32xf32>
    %cst_17 = arith.constant 9.99999974E-6 : f32
    %33 = vector.broadcast %cst_17 : f32 to vector<32x1xf32>
    %34 = arith.addf %30, %33 : vector<32x1xf32>
    %35 = math.rsqrt %34 : vector<32x1xf32>
    %36 = vector.broadcast %35 : vector<32x1xf32> to vector<32x32xf32>
    %37 = arith.mulf %32, %36 : vector<32x32xf32>
    %38 = vector.broadcast %18 : vector<1x32xf32> to vector<32x32xf32>
    %39 = arith.mulf %37, %38 : vector<32x32xf32>
    %40 = vector.broadcast %19 : vector<1x32xf32> to vector<32x32xf32>
    %41 = arith.addf %39, %40 : vector<32x32xf32>
    %c0_18 = arith.constant 0 : index
    %c0_19 = arith.constant 0 : index
    %42 = vector.load %arg2[%c0_18, %c0_19] : memref<2x8xi32, #tpu.memory_space<vmem>>, vector<2x8xi32>
    %c0_20 = arith.constant 0 : index
    %c0_21 = arith.constant 0 : index
    %43 = vector.load %arg3[%c0_20, %c0_21] : memref<2x8xi32, #tpu.memory_space<vmem>>, vector<2x8xi32>
    %44 = tpu.concatenate %42, %43 in 0 : vector<2x8xi32>, vector<2x8xi32> -> vector<4x8xi32>
    %45 = arith.sitofp %44 : vector<4x8xi32> to vector<4x8xf32>
    %cst_22 = arith.constant 1.000000e+00 : f32
    %46 = vector.broadcast %cst_22 : f32 to vector<4x8xf32>
    %47 = arith.subf %46, %45 : vector<4x8xf32>
    %cst_23 = arith.constant -1.000000e+09 : f32
    %48 = vector.broadcast %cst_23 : f32 to vector<4x8xf32>
    %49 = arith.mulf %47, %48 : vector<4x8xf32>
    %50 = vector.shape_cast %49 : vector<4x8xf32> to vector<4x1x8xf32>
    %51 = vector.shape_cast %50 : vector<4x1x8xf32> to vector<4x1x8xf32>
    %52 = vector.broadcast %51 : vector<4x1x8xf32> to vector<4x8x8xf32>
    %53 = arith.truncf %41 : vector<32x32xf32> to vector<32x32xbf16>
    %c0_24 = arith.constant 0 : index
    %c0_25 = arith.constant 0 : index
    %c0_26 = arith.constant 0 : index
    %54 = vector.load %arg8[%c0_24, %c0_25, %c0_26] : memref<2x32x96xbf16, #tpu.memory_space<vmem>>, vector<1x32x96xbf16>
    %55 = vector.shape_cast %54 : vector<1x32x96xbf16> to vector<32x96xbf16>
    %cst_27 = arith.constant dense<0.000000e+00> : vector<32x96xf32>
    %56 = tpu.matmul %53, %55, %cst_27 {dimension_numbers = #tpu.dot_dimension_numbers<[1], [0], [0], [1], [0, 0, 1, 1], [], []>} : vector<32x32xbf16>, vector<32x96xbf16>, vector<32x96xf32> -> vector<32x96xf32>
    %c0_28 = arith.constant 0 : index
    %c0_29 = arith.constant 0 : index
    %c0_30 = arith.constant 0 : index
    %57 = vector.load %arg9[%c0_28, %c0_29, %c0_30] : memref<2x1x96xf32, #tpu.memory_space<vmem>>, vector<1x1x96xf32>
    %58 = vector.shape_cast %57 : vector<1x1x96xf32> to vector<1x96xf32>
    %59 = vector.broadcast %58 : vector<1x96xf32> to vector<32x96xf32>
    %60 = arith.addf %56, %59 : vector<32x96xf32>
    %61 = arith.truncf %60 : vector<32x96xf32> to vector<32x96xbf16>
    %62 = vector.extract_strided_slice %61 {offsets = [0, 0], sizes = [32, 16], strides = [1, 1]} : vector<32x96xbf16> to vector<32x16xbf16>
    %63 = vector.shape_cast %62 : vector<32x16xbf16> to vector<4x8x16xbf16>
    %64 = vector.extract_strided_slice %61 {offsets = [0, 32], sizes = [32, 16], strides = [1, 1]} : vector<32x96xbf16> to vector<32x16xbf16>
    %65 = vector.shape_cast %64 : vector<32x16xbf16> to vector<4x8x16xbf16>
    %66 = vector.extract_strided_slice %61 {offsets = [0, 64], sizes = [32, 16], strides = [1, 1]} : vector<32x96xbf16> to vector<32x16xbf16>
    %67 = vector.shape_cast %66 : vector<32x16xbf16> to vector<4x8x16xbf16>
    "tpu.trace_start"() <{level = 10 : i32, message = "pqd,pkd->pqk"}> : () -> ()
    %cst_31 = arith.constant dense<0.000000e+00> : vector<4x8x8xf32>
    %68 = tpu.matmul %63, %65, %cst_31 {dimension_numbers = #tpu.dot_dimension_numbers<[2], [2], [1], [1], [0, 0, 0, 1, 1, 1], [0], [0]>} : vector<4x8x16xbf16>, vector<4x8x16xbf16>, vector<4x8x8xf32> -> vector<4x8x8xf32>
    "tpu.trace_stop"() : () -> ()
    %69 = arith.addf %68, %52 : vector<4x8x8xf32>
    %cst_32 = arith.constant dense<0xFF800000> : vector<4x8xf32>
    %70 = vector.multi_reduction <maximumf>, %69, %cst_32 [2] : vector<4x8x8xf32> to vector<4x8xf32>
    %71 = vector.shape_cast %70 : vector<4x8xf32> to vector<4x8x1xf32>
    %72 = vector.broadcast %71 : vector<4x8x1xf32> to vector<4x8x8xf32>
    %73 = arith.subf %69, %72 : vector<4x8x8xf32>
    %74 = math.exp %73 : vector<4x8x8xf32>
    %cst_33 = arith.constant dense<0.000000e+00> : vector<4x8xf32>
    %75 = vector.multi_reduction <add>, %74, %cst_33 [2] : vector<4x8x8xf32> to vector<4x8xf32>
    %76 = vector.shape_cast %75 : vector<4x8xf32> to vector<4x8x1xf32>
    %77 = tpu.reciprocal %76 {approx = true} : vector<4x8x1xf32> -> vector<4x8x1xf32>
    %78 = vector.broadcast %77 : vector<4x8x1xf32> to vector<4x8x8xf32>
    %79 = arith.mulf %74, %78 : vector<4x8x8xf32>
    %80 = arith.truncf %79 : vector<4x8x8xf32> to vector<4x8x8xbf16>
    "tpu.trace_start"() <{level = 10 : i32, message = "pqk,pkd->pqd"}> : () -> ()
    %cst_34 = arith.constant dense<0.000000e+00> : vector<4x8x16xf32>
    %81 = tpu.matmul %80, %67, %cst_34 {dimension_numbers = #tpu.dot_dimension_numbers<[2], [1], [1], [2], [0, 0, 0, 1, 1, 2], [0], [0]>} : vector<4x8x8xbf16>, vector<4x8x16xbf16>, vector<4x8x16xf32> -> vector<4x8x16xf32>
    "tpu.trace_stop"() : () -> ()
    %82 = vector.shape_cast %81 : vector<4x8x16xf32> to vector<32x16xf32>
    %83 = vector.extract_strided_slice %61 {offsets = [0, 16], sizes = [32, 16], strides = [1, 1]} : vector<32x96xbf16> to vector<32x16xbf16>
    %84 = vector.shape_cast %83 : vector<32x16xbf16> to vector<4x8x16xbf16>
    %85 = vector.extract_strided_slice %61 {offsets = [0, 48], sizes = [32, 16], strides = [1, 1]} : vector<32x96xbf16> to vector<32x16xbf16>
    %86 = vector.shape_cast %85 : vector<32x16xbf16> to vector<4x8x16xbf16>
    %87 = vector.extract_strided_slice %61 {offsets = [0, 80], sizes = [32, 16], strides = [1, 1]} : vector<32x96xbf16> to vector<32x16xbf16>
    %88 = vector.shape_cast %87 : vector<32x16xbf16> to vector<4x8x16xbf16>
    "tpu.trace_start"() <{level = 10 : i32, message = "pqd,pkd->pqk"}> : () -> ()
    %cst_35 = arith.constant dense<0.000000e+00> : vector<4x8x8xf32>
    %89 = tpu.matmul %84, %86, %cst_35 {dimension_numbers = #tpu.dot_dimension_numbers<[2], [2], [1], [1], [0, 0, 0, 1, 1, 1], [0], [0]>} : vector<4x8x16xbf16>, vector<4x8x16xbf16>, vector<4x8x8xf32> -> vector<4x8x8xf32>
    "tpu.trace_stop"() : () -> ()
    %90 = arith.addf %89, %52 : vector<4x8x8xf32>
    %cst_36 = arith.constant dense<0xFF800000> : vector<4x8xf32>
    %91 = vector.multi_reduction <maximumf>, %90, %cst_36 [2] : vector<4x8x8xf32> to vector<4x8xf32>
    %92 = vector.shape_cast %91 : vector<4x8xf32> to vector<4x8x1xf32>
    %93 = vector.broadcast %92 : vector<4x8x1xf32> to vector<4x8x8xf32>
    %94 = arith.subf %90, %93 : vector<4x8x8xf32>
    %95 = math.exp %94 : vector<4x8x8xf32>
    %cst_37 = arith.constant dense<0.000000e+00> : vector<4x8xf32>
    %96 = vector.multi_reduction <add>, %95, %cst_37 [2] : vector<4x8x8xf32> to vector<4x8xf32>
    %97 = vector.shape_cast %96 : vector<4x8xf32> to vector<4x8x1xf32>
    %98 = tpu.reciprocal %97 {approx = true} : vector<4x8x1xf32> -> vector<4x8x1xf32>
    %99 = vector.broadcast %98 : vector<4x8x1xf32> to vector<4x8x8xf32>
    %100 = arith.mulf %95, %99 : vector<4x8x8xf32>
    %101 = arith.truncf %100 : vector<4x8x8xf32> to vector<4x8x8xbf16>
    "tpu.trace_start"() <{level = 10 : i32, message = "pqk,pkd->pqd"}> : () -> ()
    %cst_38 = arith.constant dense<0.000000e+00> : vector<4x8x16xf32>
    %102 = tpu.matmul %101, %88, %cst_38 {dimension_numbers = #tpu.dot_dimension_numbers<[2], [1], [1], [2], [0, 0, 0, 1, 1, 2], [0], [0]>} : vector<4x8x8xbf16>, vector<4x8x16xbf16>, vector<4x8x16xf32> -> vector<4x8x16xf32>
    "tpu.trace_stop"() : () -> ()
    %103 = vector.shape_cast %102 : vector<4x8x16xf32> to vector<32x16xf32>
    %104 = tpu.concatenate %82, %103 in 1 : vector<32x16xf32>, vector<32x16xf32> -> vector<32x32xf32>
    %105 = arith.truncf %104 : vector<32x32xf32> to vector<32x32xbf16>
    %c0_39 = arith.constant 0 : index
    %c0_40 = arith.constant 0 : index
    %c0_41 = arith.constant 0 : index
    %106 = vector.load %arg10[%c0_39, %c0_40, %c0_41] : memref<2x32x32xbf16, #tpu.memory_space<vmem>>, vector<1x32x32xbf16>
    %107 = vector.shape_cast %106 : vector<1x32x32xbf16> to vector<32x32xbf16>
    %cst_42 = arith.constant dense<0.000000e+00> : vector<32x32xf32>
    %108 = tpu.matmul %105, %107, %cst_42 {dimension_numbers = #tpu.dot_dimension_numbers<[1], [0], [0], [1], [0, 0, 1, 1], [], []>} : vector<32x32xbf16>, vector<32x32xbf16>, vector<32x32xf32> -> vector<32x32xf32>
    %c0_43 = arith.constant 0 : index
    %c0_44 = arith.constant 0 : index
    %c0_45 = arith.constant 0 : index
    %109 = vector.load %arg11[%c0_43, %c0_44, %c0_45] : memref<2x1x32xf32, #tpu.memory_space<vmem>>, vector<1x1x32xf32>
    %110 = vector.shape_cast %109 : vector<1x1x32xf32> to vector<1x32xf32>
    %111 = vector.broadcast %110 : vector<1x32xf32> to vector<32x32xf32>
    %112 = arith.addf %108, %111 : vector<32x32xf32>
    %113 = arith.addf %41, %112 : vector<32x32xf32>
    %c0_46 = arith.constant 0 : index
    %c0_47 = arith.constant 0 : index
    %c0_48 = arith.constant 0 : index
    %114 = vector.load %arg12[%c0_46, %c0_47, %c0_48] : memref<2x1x32xf32, #tpu.memory_space<vmem>>, vector<1x1x32xf32>
    %115 = vector.shape_cast %114 : vector<1x1x32xf32> to vector<1x32xf32>
    %c0_49 = arith.constant 0 : index
    %c0_50 = arith.constant 0 : index
    %c0_51 = arith.constant 0 : index
    %116 = vector.load %arg13[%c0_49, %c0_50, %c0_51] : memref<2x1x32xf32, #tpu.memory_space<vmem>>, vector<1x1x32xf32>
    %117 = vector.shape_cast %116 : vector<1x1x32xf32> to vector<1x32xf32>
    %cst_52 = arith.constant dense<0.000000e+00> : vector<32xf32>
    %118 = vector.multi_reduction <add>, %113, %cst_52 [1] : vector<32x32xf32> to vector<32xf32>
    %119 = vector.shape_cast %118 : vector<32xf32> to vector<32x1xf32>
    %cst_53 = arith.constant 3.200000e+01 : f32
    %120 = vector.broadcast %cst_53 : f32 to vector<32x1xf32>
    %121 = arith.divf %119, %120 : vector<32x1xf32>
    %122 = vector.broadcast %121 : vector<32x1xf32> to vector<32x32xf32>
    %123 = arith.subf %113, %122 : vector<32x32xf32>
    %124 = arith.mulf %123, %123 : vector<32x32xf32>
    %cst_54 = arith.constant dense<0.000000e+00> : vector<32xf32>
    %125 = vector.multi_reduction <add>, %124, %cst_54 [1] : vector<32x32xf32> to vector<32xf32>
    %126 = vector.shape_cast %125 : vector<32xf32> to vector<32x1xf32>
    %cst_55 = arith.constant 3.200000e+01 : f32
    %127 = vector.broadcast %cst_55 : f32 to vector<32x1xf32>
    %128 = arith.divf %126, %127 : vector<32x1xf32>
    %129 = vector.broadcast %121 : vector<32x1xf32> to vector<32x32xf32>
    %130 = arith.subf %113, %129 : vector<32x32xf32>
    %cst_56 = arith.constant 9.99999974E-6 : f32
    %131 = vector.broadcast %cst_56 : f32 to vector<32x1xf32>
    %132 = arith.addf %128, %131 : vector<32x1xf32>
    %133 = math.rsqrt %132 : vector<32x1xf32>
    %134 = vector.broadcast %133 : vector<32x1xf32> to vector<32x32xf32>
    %135 = arith.mulf %130, %134 : vector<32x32xf32>
    %136 = vector.broadcast %115 : vector<1x32xf32> to vector<32x32xf32>
    %137 = arith.mulf %135, %136 : vector<32x32xf32>
    %138 = vector.broadcast %117 : vector<1x32xf32> to vector<32x32xf32>
    %139 = arith.addf %137, %138 : vector<32x32xf32>
    %140 = arith.truncf %139 : vector<32x32xf32> to vector<32x32xbf16>
    %c0_57 = arith.constant 0 : index
    %c0_58 = arith.constant 0 : index
    %c0_59 = arith.constant 0 : index
    %141 = vector.load %arg14[%c0_57, %c0_58, %c0_59] : memref<2x32x64xbf16, #tpu.memory_space<vmem>>, vector<1x32x64xbf16>
    %142 = vector.shape_cast %141 : vector<1x32x64xbf16> to vector<32x64xbf16>
    %cst_60 = arith.constant dense<0.000000e+00> : vector<32x64xf32>
    %143 = tpu.matmul %140, %142, %cst_60 {dimension_numbers = #tpu.dot_dimension_numbers<[1], [0], [0], [1], [0, 0, 1, 1], [], []>} : vector<32x32xbf16>, vector<32x64xbf16>, vector<32x64xf32> -> vector<32x64xf32>
    %c0_61 = arith.constant 0 : index
    %c0_62 = arith.constant 0 : index
    %c0_63 = arith.constant 0 : index
    %144 = vector.load %arg15[%c0_61, %c0_62, %c0_63] : memref<2x1x64xf32, #tpu.memory_space<vmem>>, vector<1x1x64xf32>
    %145 = vector.shape_cast %144 : vector<1x1x64xf32> to vector<1x64xf32>
    %146 = vector.broadcast %145 : vector<1x64xf32> to vector<32x64xf32>
    %147 = arith.addf %143, %146 : vector<32x64xf32>
    %148 = arith.mulf %147, %147 : vector<32x64xf32>
    %149 = arith.mulf %147, %148 : vector<32x64xf32>
    %cst_64 = arith.constant 4.471500e-02 : f32
    %150 = vector.broadcast %cst_64 : f32 to vector<32x64xf32>
    %151 = arith.mulf %150, %149 : vector<32x64xf32>
    %152 = arith.addf %147, %151 : vector<32x64xf32>
    %cst_65 = arith.constant 0.797884583 : f32
    %153 = vector.broadcast %cst_65 : f32 to vector<32x64xf32>
    %154 = arith.mulf %153, %152 : vector<32x64xf32>
    %155 = math.tanh %154 : vector<32x64xf32>
    %cst_66 = arith.constant 1.000000e+00 : f32
    %156 = vector.broadcast %cst_66 : f32 to vector<32x64xf32>
    %157 = arith.addf %156, %155 : vector<32x64xf32>
    %cst_67 = arith.constant 5.000000e-01 : f32
    %158 = vector.broadcast %cst_67 : f32 to vector<32x64xf32>
    %159 = arith.mulf %158, %157 : vector<32x64xf32>
    %160 = arith.mulf %147, %159 : vector<32x64xf32>
    %161 = arith.truncf %160 : vector<32x64xf32> to vector<32x64xbf16>
    %c0_68 = arith.constant 0 : index
    %c0_69 = arith.constant 0 : index
    %c0_70 = arith.constant 0 : index
    %162 = vector.load %arg16[%c0_68, %c0_69, %c0_70] : memref<2x64x32xbf16, #tpu.memory_space<vmem>>, vector<1x64x32xbf16>
    %163 = vector.shape_cast %162 : vector<1x64x32xbf16> to vector<64x32xbf16>
    %cst_71 = arith.constant dense<0.000000e+00> : vector<32x32xf32>
    %164 = tpu.matmul %161, %163, %cst_71 {dimension_numbers = #tpu.dot_dimension_numbers<[1], [0], [0], [1], [0, 0, 1, 1], [], []>} : vector<32x64xbf16>, vector<64x32xbf16>, vector<32x32xf32> -> vector<32x32xf32>
    %c0_72 = arith.constant 0 : index
    %c0_73 = arith.constant 0 : index
    %c0_74 = arith.constant 0 : index
    %165 = vector.load %arg17[%c0_72, %c0_73, %c0_74] : memref<2x1x32xf32, #tpu.memory_space<vmem>>, vector<1x1x32xf32>
    %166 = vector.shape_cast %165 : vector<1x1x32xf32> to vector<1x32xf32>
    %167 = vector.broadcast %166 : vector<1x32xf32> to vector<32x32xf32>
    %168 = arith.addf %164, %167 : vector<32x32xf32>
    %169 = arith.addf %139, %168 : vector<32x32xf32>
    %c0_75 = arith.constant 0 : index
    %c0_76 = arith.constant 0 : index
    %c0_77 = arith.constant 0 : index
    %170 = vector.load %arg18[%c0_75, %c0_76, %c0_77] : memref<2x1x32xf32, #tpu.memory_space<vmem>>, vector<1x1x32xf32>
    %171 = vector.shape_cast %170 : vector<1x1x32xf32> to vector<1x32xf32>
    %c0_78 = arith.constant 0 : index
    %c0_79 = arith.constant 0 : index
    %c0_80 = arith.constant 0 : index
    %172 = vector.load %arg19[%c0_78, %c0_79, %c0_80] : memref<2x1x32xf32, #tpu.memory_space<vmem>>, vector<1x1x32xf32>
    %173 = vector.shape_cast %172 : vector<1x1x32xf32> to vector<1x32xf32>
    %cst_81 = arith.constant dense<0.000000e+00> : vector<32xf32>
    %174 = vector.multi_reduction <add>, %169, %cst_81 [1] : vector<32x32xf32> to vector<32xf32>
    %175 = vector.shape_cast %174 : vector<32xf32> to vector<32x1xf32>
    %cst_82 = arith.constant 3.200000e+01 : f32
    %176 = vector.broadcast %cst_82 : f32 to vector<32x1xf32>
    %177 = arith.divf %175, %176 : vector<32x1xf32>
    %178 = vector.broadcast %177 : vector<32x1xf32> to vector<32x32xf32>
    %179 = arith.subf %169, %178 : vector<32x32xf32>
    %180 = arith.mulf %179, %179 : vector<32x32xf32>
    %cst_83 = arith.constant dense<0.000000e+00> : vector<32xf32>
    %181 = vector.multi_reduction <add>, %180, %cst_83 [1] : vector<32x32xf32> to vector<32xf32>
    %182 = vector.shape_cast %181 : vector<32xf32> to vector<32x1xf32>
    %cst_84 = arith.constant 3.200000e+01 : f32
    %183 = vector.broadcast %cst_84 : f32 to vector<32x1xf32>
    %184 = arith.divf %182, %183 : vector<32x1xf32>
    %185 = vector.broadcast %177 : vector<32x1xf32> to vector<32x32xf32>
    %186 = arith.subf %169, %185 : vector<32x32xf32>
    %cst_85 = arith.constant 9.99999974E-6 : f32
    %187 = vector.broadcast %cst_85 : f32 to vector<32x1xf32>
    %188 = arith.addf %184, %187 : vector<32x1xf32>
    %189 = math.rsqrt %188 : vector<32x1xf32>
    %190 = vector.broadcast %189 : vector<32x1xf32> to vector<32x32xf32>
    %191 = arith.mulf %186, %190 : vector<32x32xf32>
    %192 = vector.broadcast %171 : vector<1x32xf32> to vector<32x32xf32>
    %193 = arith.mulf %191, %192 : vector<32x32xf32>
    %194 = vector.broadcast %173 : vector<1x32xf32> to vector<32x32xf32>
    %195 = arith.addf %193, %194 : vector<32x32xf32>
    %196 = arith.truncf %195 : vector<32x32xf32> to vector<32x32xbf16>
    %c1 = arith.constant 1 : index
    %c0_86 = arith.constant 0 : index
    %c0_87 = arith.constant 0 : index
    %197 = vector.load %arg8[%c1, %c0_86, %c0_87] : memref<2x32x96xbf16, #tpu.memory_space<vmem>>, vector<1x32x96xbf16>
    %198 = vector.shape_cast %197 : vector<1x32x96xbf16> to vector<32x96xbf16>
    %cst_88 = arith.constant dense<0.000000e+00> : vector<32x96xf32>
    %199 = tpu.matmul %196, %198, %cst_88 {dimension_numbers = #tpu.dot_dimension_numbers<[1], [0], [0], [1], [0, 0, 1, 1], [], []>} : vector<32x32xbf16>, vector<32x96xbf16>, vector<32x96xf32> -> vector<32x96xf32>
    %c1_89 = arith.constant 1 : index
    %c0_90 = arith.constant 0 : index
    %c0_91 = arith.constant 0 : index
    %200 = vector.load %arg9[%c1_89, %c0_90, %c0_91] : memref<2x1x96xf32, #tpu.memory_space<vmem>>, vector<1x1x96xf32>
    %201 = vector.shape_cast %200 : vector<1x1x96xf32> to vector<1x96xf32>
    %202 = vector.broadcast %201 : vector<1x96xf32> to vector<32x96xf32>
    %203 = arith.addf %199, %202 : vector<32x96xf32>
    %204 = arith.truncf %203 : vector<32x96xf32> to vector<32x96xbf16>
    %205 = vector.extract_strided_slice %204 {offsets = [0, 0], sizes = [32, 16], strides = [1, 1]} : vector<32x96xbf16> to vector<32x16xbf16>
    %206 = vector.shape_cast %205 : vector<32x16xbf16> to vector<4x8x16xbf16>
    %207 = vector.extract_strided_slice %204 {offsets = [0, 32], sizes = [32, 16], strides = [1, 1]} : vector<32x96xbf16> to vector<32x16xbf16>
    %208 = vector.shape_cast %207 : vector<32x16xbf16> to vector<4x8x16xbf16>
    %209 = vector.extract_strided_slice %204 {offsets = [0, 64], sizes = [32, 16], strides = [1, 1]} : vector<32x96xbf16> to vector<32x16xbf16>
    %210 = vector.shape_cast %209 : vector<32x16xbf16> to vector<4x8x16xbf16>
    "tpu.trace_start"() <{level = 10 : i32, message = "pqd,pkd->pqk"}> : () -> ()
    %cst_92 = arith.constant dense<0.000000e+00> : vector<4x8x8xf32>
    %211 = tpu.matmul %206, %208, %cst_92 {dimension_numbers = #tpu.dot_dimension_numbers<[2], [2], [1], [1], [0, 0, 0, 1, 1, 1], [0], [0]>} : vector<4x8x16xbf16>, vector<4x8x16xbf16>, vector<4x8x8xf32> -> vector<4x8x8xf32>
    "tpu.trace_stop"() : () -> ()
    %212 = arith.addf %211, %52 : vector<4x8x8xf32>
    %cst_93 = arith.constant dense<0xFF800000> : vector<4x8xf32>
    %213 = vector.multi_reduction <maximumf>, %212, %cst_93 [2] : vector<4x8x8xf32> to vector<4x8xf32>
    %214 = vector.shape_cast %213 : vector<4x8xf32> to vector<4x8x1xf32>
    %215 = vector.broadcast %214 : vector<4x8x1xf32> to vector<4x8x8xf32>
    %216 = arith.subf %212, %215 : vector<4x8x8xf32>
    %217 = math.exp %216 : vector<4x8x8xf32>
    %cst_94 = arith.constant dense<0.000000e+00> : vector<4x8xf32>
    %218 = vector.multi_reduction <add>, %217, %cst_94 [2] : vector<4x8x8xf32> to vector<4x8xf32>
    %219 = vector.shape_cast %218 : vector<4x8xf32> to vector<4x8x1xf32>
    %220 = tpu.reciprocal %219 {approx = true} : vector<4x8x1xf32> -> vector<4x8x1xf32>
    %221 = vector.broadcast %220 : vector<4x8x1xf32> to vector<4x8x8xf32>
    %222 = arith.mulf %217, %221 : vector<4x8x8xf32>
    %223 = arith.truncf %222 : vector<4x8x8xf32> to vector<4x8x8xbf16>
    "tpu.trace_start"() <{level = 10 : i32, message = "pqk,pkd->pqd"}> : () -> ()
    %cst_95 = arith.constant dense<0.000000e+00> : vector<4x8x16xf32>
    %224 = tpu.matmul %223, %210, %cst_95 {dimension_numbers = #tpu.dot_dimension_numbers<[2], [1], [1], [2], [0, 0, 0, 1, 1, 2], [0], [0]>} : vector<4x8x8xbf16>, vector<4x8x16xbf16>, vector<4x8x16xf32> -> vector<4x8x16xf32>
    "tpu.trace_stop"() : () -> ()
    %225 = vector.shape_cast %224 : vector<4x8x16xf32> to vector<32x16xf32>
    %226 = vector.extract_strided_slice %204 {offsets = [0, 16], sizes = [32, 16], strides = [1, 1]} : vector<32x96xbf16> to vector<32x16xbf16>
    %227 = vector.shape_cast %226 : vector<32x16xbf16> to vector<4x8x16xbf16>
    %228 = vector.extract_strided_slice %204 {offsets = [0, 48], sizes = [32, 16], strides = [1, 1]} : vector<32x96xbf16> to vector<32x16xbf16>
    %229 = vector.shape_cast %228 : vector<32x16xbf16> to vector<4x8x16xbf16>
    %230 = vector.extract_strided_slice %204 {offsets = [0, 80], sizes = [32, 16], strides = [1, 1]} : vector<32x96xbf16> to vector<32x16xbf16>
    %231 = vector.shape_cast %230 : vector<32x16xbf16> to vector<4x8x16xbf16>
    "tpu.trace_start"() <{level = 10 : i32, message = "pqd,pkd->pqk"}> : () -> ()
    %cst_96 = arith.constant dense<0.000000e+00> : vector<4x8x8xf32>
    %232 = tpu.matmul %227, %229, %cst_96 {dimension_numbers = #tpu.dot_dimension_numbers<[2], [2], [1], [1], [0, 0, 0, 1, 1, 1], [0], [0]>} : vector<4x8x16xbf16>, vector<4x8x16xbf16>, vector<4x8x8xf32> -> vector<4x8x8xf32>
    "tpu.trace_stop"() : () -> ()
    %233 = arith.addf %232, %52 : vector<4x8x8xf32>
    %cst_97 = arith.constant dense<0xFF800000> : vector<4x8xf32>
    %234 = vector.multi_reduction <maximumf>, %233, %cst_97 [2] : vector<4x8x8xf32> to vector<4x8xf32>
    %235 = vector.shape_cast %234 : vector<4x8xf32> to vector<4x8x1xf32>
    %236 = vector.broadcast %235 : vector<4x8x1xf32> to vector<4x8x8xf32>
    %237 = arith.subf %233, %236 : vector<4x8x8xf32>
    %238 = math.exp %237 : vector<4x8x8xf32>
    %cst_98 = arith.constant dense<0.000000e+00> : vector<4x8xf32>
    %239 = vector.multi_reduction <add>, %238, %cst_98 [2] : vector<4x8x8xf32> to vector<4x8xf32>
    %240 = vector.shape_cast %239 : vector<4x8xf32> to vector<4x8x1xf32>
    %241 = tpu.reciprocal %240 {approx = true} : vector<4x8x1xf32> -> vector<4x8x1xf32>
    %242 = vector.broadcast %241 : vector<4x8x1xf32> to vector<4x8x8xf32>
    %243 = arith.mulf %238, %242 : vector<4x8x8xf32>
    %244 = arith.truncf %243 : vector<4x8x8xf32> to vector<4x8x8xbf16>
    "tpu.trace_start"() <{level = 10 : i32, message = "pqk,pkd->pqd"}> : () -> ()
    %cst_99 = arith.constant dense<0.000000e+00> : vector<4x8x16xf32>
    %245 = tpu.matmul %244, %231, %cst_99 {dimension_numbers = #tpu.dot_dimension_numbers<[2], [1], [1], [2], [0, 0, 0, 1, 1, 2], [0], [0]>} : vector<4x8x8xbf16>, vector<4x8x16xbf16>, vector<4x8x16xf32> -> vector<4x8x16xf32>
    "tpu.trace_stop"() : () -> ()
    %246 = vector.shape_cast %245 : vector<4x8x16xf32> to vector<32x16xf32>
    %247 = tpu.concatenate %225, %246 in 1 : vector<32x16xf32>, vector<32x16xf32> -> vector<32x32xf32>
    %248 = arith.truncf %247 : vector<32x32xf32> to vector<32x32xbf16>
    %c1_100 = arith.constant 1 : index
    %c0_101 = arith.constant 0 : index
    %c0_102 = arith.constant 0 : index
    %249 = vector.load %arg10[%c1_100, %c0_101, %c0_102] : memref<2x32x32xbf16, #tpu.memory_space<vmem>>, vector<1x32x32xbf16>
    %250 = vector.shape_cast %249 : vector<1x32x32xbf16> to vector<32x32xbf16>
    %cst_103 = arith.constant dense<0.000000e+00> : vector<32x32xf32>
    %251 = tpu.matmul %248, %250, %cst_103 {dimension_numbers = #tpu.dot_dimension_numbers<[1], [0], [0], [1], [0, 0, 1, 1], [], []>} : vector<32x32xbf16>, vector<32x32xbf16>, vector<32x32xf32> -> vector<32x32xf32>
    %c1_104 = arith.constant 1 : index
    %c0_105 = arith.constant 0 : index
    %c0_106 = arith.constant 0 : index
    %252 = vector.load %arg11[%c1_104, %c0_105, %c0_106] : memref<2x1x32xf32, #tpu.memory_space<vmem>>, vector<1x1x32xf32>
    %253 = vector.shape_cast %252 : vector<1x1x32xf32> to vector<1x32xf32>
    %254 = vector.broadcast %253 : vector<1x32xf32> to vector<32x32xf32>
    %255 = arith.addf %251, %254 : vector<32x32xf32>
    %256 = arith.addf %195, %255 : vector<32x32xf32>
    %c1_107 = arith.constant 1 : index
    %c0_108 = arith.constant 0 : index
    %c0_109 = arith.constant 0 : index
    %257 = vector.load %arg12[%c1_107, %c0_108, %c0_109] : memref<2x1x32xf32, #tpu.memory_space<vmem>>, vector<1x1x32xf32>
    %258 = vector.shape_cast %257 : vector<1x1x32xf32> to vector<1x32xf32>
    %c1_110 = arith.constant 1 : index
    %c0_111 = arith.constant 0 : index
    %c0_112 = arith.constant 0 : index
    %259 = vector.load %arg13[%c1_110, %c0_111, %c0_112] : memref<2x1x32xf32, #tpu.memory_space<vmem>>, vector<1x1x32xf32>
    %260 = vector.shape_cast %259 : vector<1x1x32xf32> to vector<1x32xf32>
    %cst_113 = arith.constant dense<0.000000e+00> : vector<32xf32>
    %261 = vector.multi_reduction <add>, %256, %cst_113 [1] : vector<32x32xf32> to vector<32xf32>
    %262 = vector.shape_cast %261 : vector<32xf32> to vector<32x1xf32>
    %cst_114 = arith.constant 3.200000e+01 : f32
    %263 = vector.broadcast %cst_114 : f32 to vector<32x1xf32>
    %264 = arith.divf %262, %263 : vector<32x1xf32>
    %265 = vector.broadcast %264 : vector<32x1xf32> to vector<32x32xf32>
    %266 = arith.subf %256, %265 : vector<32x32xf32>
    %267 = arith.mulf %266, %266 : vector<32x32xf32>
    %cst_115 = arith.constant dense<0.000000e+00> : vector<32xf32>
    %268 = vector.multi_reduction <add>, %267, %cst_115 [1] : vector<32x32xf32> to vector<32xf32>
    %269 = vector.shape_cast %268 : vector<32xf32> to vector<32x1xf32>
    %cst_116 = arith.constant 3.200000e+01 : f32
    %270 = vector.broadcast %cst_116 : f32 to vector<32x1xf32>
    %271 = arith.divf %269, %270 : vector<32x1xf32>
    %272 = vector.broadcast %264 : vector<32x1xf32> to vector<32x32xf32>
    %273 = arith.subf %256, %272 : vector<32x32xf32>
    %cst_117 = arith.constant 9.99999974E-6 : f32
    %274 = vector.broadcast %cst_117 : f32 to vector<32x1xf32>
    %275 = arith.addf %271, %274 : vector<32x1xf32>
    %276 = math.rsqrt %275 : vector<32x1xf32>
    %277 = vector.broadcast %276 : vector<32x1xf32> to vector<32x32xf32>
    %278 = arith.mulf %273, %277 : vector<32x32xf32>
    %279 = vector.broadcast %258 : vector<1x32xf32> to vector<32x32xf32>
    %280 = arith.mulf %278, %279 : vector<32x32xf32>
    %281 = vector.broadcast %260 : vector<1x32xf32> to vector<32x32xf32>
    %282 = arith.addf %280, %281 : vector<32x32xf32>
    %283 = arith.truncf %282 : vector<32x32xf32> to vector<32x32xbf16>
    %c1_118 = arith.constant 1 : index
    %c0_119 = arith.constant 0 : index
    %c0_120 = arith.constant 0 : index
    %284 = vector.load %arg14[%c1_118, %c0_119, %c0_120] : memref<2x32x64xbf16, #tpu.memory_space<vmem>>, vector<1x32x64xbf16>
    %285 = vector.shape_cast %284 : vector<1x32x64xbf16> to vector<32x64xbf16>
    %cst_121 = arith.constant dense<0.000000e+00> : vector<32x64xf32>
    %286 = tpu.matmul %283, %285, %cst_121 {dimension_numbers = #tpu.dot_dimension_numbers<[1], [0], [0], [1], [0, 0, 1, 1], [], []>} : vector<32x32xbf16>, vector<32x64xbf16>, vector<32x64xf32> -> vector<32x64xf32>
    %c1_122 = arith.constant 1 : index
    %c0_123 = arith.constant 0 : index
    %c0_124 = arith.constant 0 : index
    %287 = vector.load %arg15[%c1_122, %c0_123, %c0_124] : memref<2x1x64xf32, #tpu.memory_space<vmem>>, vector<1x1x64xf32>
    %288 = vector.shape_cast %287 : vector<1x1x64xf32> to vector<1x64xf32>
    %289 = vector.broadcast %288 : vector<1x64xf32> to vector<32x64xf32>
    %290 = arith.addf %286, %289 : vector<32x64xf32>
    %291 = arith.mulf %290, %290 : vector<32x64xf32>
    %292 = arith.mulf %290, %291 : vector<32x64xf32>
    %cst_125 = arith.constant 4.471500e-02 : f32
    %293 = vector.broadcast %cst_125 : f32 to vector<32x64xf32>
    %294 = arith.mulf %293, %292 : vector<32x64xf32>
    %295 = arith.addf %290, %294 : vector<32x64xf32>
    %cst_126 = arith.constant 0.797884583 : f32
    %296 = vector.broadcast %cst_126 : f32 to vector<32x64xf32>
    %297 = arith.mulf %296, %295 : vector<32x64xf32>
    %298 = math.tanh %297 : vector<32x64xf32>
    %cst_127 = arith.constant 1.000000e+00 : f32
    %299 = vector.broadcast %cst_127 : f32 to vector<32x64xf32>
    %300 = arith.addf %299, %298 : vector<32x64xf32>
    %cst_128 = arith.constant 5.000000e-01 : f32
    %301 = vector.broadcast %cst_128 : f32 to vector<32x64xf32>
    %302 = arith.mulf %301, %300 : vector<32x64xf32>
    %303 = arith.mulf %290, %302 : vector<32x64xf32>
    %304 = arith.truncf %303 : vector<32x64xf32> to vector<32x64xbf16>
    %c1_129 = arith.constant 1 : index
    %c0_130 = arith.constant 0 : index
    %c0_131 = arith.constant 0 : index
    %305 = vector.load %arg16[%c1_129, %c0_130, %c0_131] : memref<2x64x32xbf16, #tpu.memory_space<vmem>>, vector<1x64x32xbf16>
    %306 = vector.shape_cast %305 : vector<1x64x32xbf16> to vector<64x32xbf16>
    %cst_132 = arith.constant dense<0.000000e+00> : vector<32x32xf32>
    %307 = tpu.matmul %304, %306, %cst_132 {dimension_numbers = #tpu.dot_dimension_numbers<[1], [0], [0], [1], [0, 0, 1, 1], [], []>} : vector<32x64xbf16>, vector<64x32xbf16>, vector<32x32xf32> -> vector<32x32xf32>
    %c1_133 = arith.constant 1 : index
    %c0_134 = arith.constant 0 : index
    %c0_135 = arith.constant 0 : index
    %308 = vector.load %arg17[%c1_133, %c0_134, %c0_135] : memref<2x1x32xf32, #tpu.memory_space<vmem>>, vector<1x1x32xf32>
    %309 = vector.shape_cast %308 : vector<1x1x32xf32> to vector<1x32xf32>
    %310 = vector.broadcast %309 : vector<1x32xf32> to vector<32x32xf32>
    %311 = arith.addf %307, %310 : vector<32x32xf32>
    %312 = arith.addf %282, %311 : vector<32x32xf32>
    %c1_136 = arith.constant 1 : index
    %c0_137 = arith.constant 0 : index
    %c0_138 = arith.constant 0 : index
    %313 = vector.load %arg18[%c1_136, %c0_137, %c0_138] : memref<2x1x32xf32, #tpu.memory_space<vmem>>, vector<1x1x32xf32>
    %314 = vector.shape_cast %313 : vector<1x1x32xf32> to vector<1x32xf32>
    %c1_139 = arith.constant 1 : index
    %c0_140 = arith.constant 0 : index
    %c0_141 = arith.constant 0 : index
    %315 = vector.load %arg19[%c1_139, %c0_140, %c0_141] : memref<2x1x32xf32, #tpu.memory_space<vmem>>, vector<1x1x32xf32>
    %316 = vector.shape_cast %315 : vector<1x1x32xf32> to vector<1x32xf32>
    %cst_142 = arith.constant dense<0.000000e+00> : vector<32xf32>
    %317 = vector.multi_reduction <add>, %312, %cst_142 [1] : vector<32x32xf32> to vector<32xf32>
    %318 = vector.shape_cast %317 : vector<32xf32> to vector<32x1xf32>
    %cst_143 = arith.constant 3.200000e+01 : f32
    %319 = vector.broadcast %cst_143 : f32 to vector<32x1xf32>
    %320 = arith.divf %318, %319 : vector<32x1xf32>
    %321 = vector.broadcast %320 : vector<32x1xf32> to vector<32x32xf32>
    %322 = arith.subf %312, %321 : vector<32x32xf32>
    %323 = arith.mulf %322, %322 : vector<32x32xf32>
    %cst_144 = arith.constant dense<0.000000e+00> : vector<32xf32>
    %324 = vector.multi_reduction <add>, %323, %cst_144 [1] : vector<32x32xf32> to vector<32xf32>
    %325 = vector.shape_cast %324 : vector<32xf32> to vector<32x1xf32>
    %cst_145 = arith.constant 3.200000e+01 : f32
    %326 = vector.broadcast %cst_145 : f32 to vector<32x1xf32>
    %327 = arith.divf %325, %326 : vector<32x1xf32>
    %328 = vector.broadcast %320 : vector<32x1xf32> to vector<32x32xf32>
    %329 = arith.subf %312, %328 : vector<32x32xf32>
    %cst_146 = arith.constant 9.99999974E-6 : f32
    %330 = vector.broadcast %cst_146 : f32 to vector<32x1xf32>
    %331 = arith.addf %327, %330 : vector<32x1xf32>
    %332 = math.rsqrt %331 : vector<32x1xf32>
    %333 = vector.broadcast %332 : vector<32x1xf32> to vector<32x32xf32>
    %334 = arith.mulf %329, %333 : vector<32x32xf32>
    %335 = vector.broadcast %314 : vector<1x32xf32> to vector<32x32xf32>
    %336 = arith.mulf %334, %335 : vector<32x32xf32>
    %337 = vector.broadcast %316 : vector<1x32xf32> to vector<32x32xf32>
    %338 = arith.addf %336, %337 : vector<32x32xf32>
    %339 = vector.shape_cast %338 : vector<32x32xf32> to vector<4x8x32xf32>
    %340 = vector.extract_strided_slice %339 {offsets = [0, 0, 0], sizes = [4, 1, 32], strides = [1, 1, 1]} : vector<4x8x32xf32> to vector<4x1x32xf32>
    %341 = vector.shape_cast %340 : vector<4x1x32xf32> to vector<4x32xf32>
    %c0_147 = arith.constant 0 : index
    %c0_148 = arith.constant 0 : index
    %342 = vector.load %arg20[%c0_147, %c0_148] : memref<1x32xf32, #tpu.memory_space<vmem>>, vector<1x32xf32>
    %343 = vector.broadcast %342 : vector<1x32xf32> to vector<4x32xf32>
    %344 = arith.mulf %341, %343 : vector<4x32xf32>
    %cst_149 = arith.constant dense<0.000000e+00> : vector<4xf32>
    %345 = vector.multi_reduction <add>, %344, %cst_149 [1] : vector<4x32xf32> to vector<4xf32>
    %346 = vector.shape_cast %345 : vector<4xf32> to vector<4x1xf32>
    %c0_150 = arith.constant 0 : index
    %c0_151 = arith.constant 0 : index
    %347 = vector.load %arg21[%c0_150, %c0_151] : memref<1x1xf32, #tpu.memory_space<vmem>>, vector<1x1xf32>
    %348 = vector.broadcast %347 : vector<1x1xf32> to vector<4x1xf32>
    %349 = arith.addf %346, %348 : vector<4x1xf32>
    %c0_152 = arith.constant 0 : index
    %c0_153 = arith.constant 0 : index
    %350 = vector.load %arg22[%c0_152, %c0_153] : memref<4x1xf32, #tpu.memory_space<vmem>>, vector<4x1xf32>
    tpu.vector_store %arg22[%c0_152, %c0_153], %349 {strides = array<i32>} : memref<4x1xf32, #tpu.memory_space<vmem>>, vector<4x1xf32>,
    return
  }
}

</mosaic_0001>

<bundles_post_ra>
// kernel: forward.1
= control target key start
LH: loop header
LB: loop body
LE: loop exit
PB: predicated region body
PF: predicated region fallthrough
CT: control target
= control target key end

     0   :  { %v2632_v0 = vmov 0   ;;  %v78_v14 = vlaneseq  ;;  %v2633_v18 = vmov 1.0|1.0   ;;  %vm192_vm6 = vcmask 261120   ;;  %s2635_s27 = smov 96   ;;  %s2639_s23 = smov 48   ;;  %s3403_s0 = inlined_call_operand.vmem [shape: s32[16,1], index: 0, kind: input, shape index: {}]   ;;  %s3404_s1 = inlined_call_operand.vmem [shape: s32[16,1], index: 1, kind: input, shape index: {}]   ;;  %s3405_s4 = inlined_call_operand.vmem [shape: bf16[128,32], index: 4, kind: input, shape index: {}]   ;;  %s3406_s5 = inlined_call_operand.vmem [shape: f32[8,32], index: 5, kind: input, shape index: {}]   ;;  %s3407_s6 = inlined_call_operand.vmem [shape: f32[1,32], index: 6, kind: input, shape index: {}]   ;;  %s3408_s7 = inlined_call_operand.vmem [shape: f32[1,32], index: 7, kind: input, shape index: {}]   ;;  %s3409_s9 = inlined_call_operand.vmem [shape: f32[2,1,96], index: 9, kind: input, shape index: {}]   ;;  %s3410_s8 = inlined_call_operand.vmem [shape: bf16[2,32,96], index: 8, kind: input, shape index: {}]   ;;  %s3411_s3 = inlined_call_operand.vmem [shape: s32[2,8], index: 3, kind: input, shape index: {}]   ;;  %s3412_s2 = inlined_call_operand.vmem [shape: s32[2,8], index: 2, kind: input, shape index: {}]   ;;  %s3413_s10 = inlined_call_operand.vmem [shape: bf16[2,32,32], index: 10, kind: input, shape index: {}]   ;;  %s3414_s11 = inlined_call_operand.vmem [shape: f32[2,1,32], index: 11, kind: input, shape index: {}]   ;;  %s3415_s12 = inlined_call_operand.vmem [shape: f32[2,1,32], index: 12, kind: input, shape index: {}]   ;;  %s3416_s13 = inlined_call_operand.vmem [shape: f32[2,1,32], index: 13, kind: input, shape index: {}]   ;;  %s3417_s15 = inlined_call_operand.vmem [shape: f32[2,1,64], index: 15, kind: input, shape index: {}]   ;;  %s3418_s14 = inlined_call_operand.vmem [shape: bf16[2,32,64], index: 14, kind: input, shape index: {}]   ;;  %s3419_s17 = inlined_call_operand.vmem [shape: f32[2,1,32], index: 17, kind: input, shape index: {}]   ;;  %s3420_s16 = inlined_call_operand.vmem [shape: bf16[2,64,32], index: 16, kind: input, shape index: {}]   ;;  %s3421_s18 = inlined_call_operand.vmem [shape: f32[2,1,32], index: 18, kind: input, shape index: {}]   ;;  %s3422_s19 = inlined_call_operand.vmem [shape: f32[2,1,32], index: 19, kind: input, shape index: {}]   ;;  %s3423_s20 = inlined_call_operand.vmem [shape: f32[1,32], index: 20, kind: input, shape index: {}]   ;;  %s3424_s21 = inlined_call_operand.<no memory space> [shape: f32[1,1], index: 21, kind: input, shape index: {}]   ;;  %s3425_s22 = inlined_call_operand.vmem [shape: f32[4,1], index: 22, kind: output, shape index: {}]  }
   0x1   :  { %3430 = sst [smem:[#allocation3_spill]] %s3403_s0  ;;  %2468 = vset.pattern.permute.xlu0 %v2632_v0  ;;  %2469 = vset.pattern.permute.xlu1 %v2632_v0  ;;  %v2634_v33 = vmov 32.0   ;;  %v2440_v60 = vld [vmem:[%s3410_s8 + $0x8] sm:$0xff]  ;;  %v2439_v63 = vld [vmem:[%s3410_s8] sm:$0xff] }
   0x2   :  { %3431 = sst [smem:[#allocation4_spill]] %s3404_s1  ;;  %v79_v15 = vand.u32 127, %v78_v14  ;;  %2510 = vrcp.f32 %v2634_v33  ;;  %356 = vmatpush.bf16.msra.mxu1 %v2440_v60  ;;  %s2640_s1 = smov 16  }
   0x3   :  { %3432 = sst [smem:[#allocation5_spill]] %s3405_s4 }
   0x4   :  { %3433 = sst [smem:[#allocation6_spill]] %s3406_s5 }
   0x5   :  { %3434 = sst [smem:[#allocation7_spill]] %s3407_s6 }
   0x6   :  { %3435 = sst [smem:[#allocation8_spill]] %s3408_s7  ;;  %357 = vmatpush.bf16.msra.mxu1 %v2439_v63 }
   0x7   :  { %3436 = sst [smem:[#allocation9_spill]] %s3409_s9 }
   0x8   :  { %s3437_s29 = sld [smem:[#allocation3_spill]]  ;;  %v2511_v34 = vpop.eup %2510 }
   0x9   :  { %s3438_s0 = sld [smem:[#allocation4_spill]]  ;;  %v206_v35 = vmul.f32 32.0, %v2511_v34  ;;  %vm210_vm7 = vweird.f32 %v2511_v34 }
   0xa   :  { %s3439_s7 = sld [smem:[#allocation5_spill]] }
   0xb   :  { %s3440_s5 = sld [smem:[#allocation6_spill]]  ;;  %v207_v36 = vsub.f32 1.0, %v206_v35 }
   0xc   :  { %s3442_s9 = sld [smem:[#allocation8_spill]] }
   0xd   :  { %v208_v37 = vmul.f32 %v2511_v34, %v207_v36  ;;  %s3443_s4 = sld [smem:[#allocation9_spill]] }
   0xe   :  { %v74_v1 = vld [vmem:[%s3437_s29] sm:$0xff]  ;;  %v75_v5 = vld [vmem:[%s3437_s29 + $0x8] sm:$0xff]  ;;  %s3441_s29 = sld [smem:[#allocation7_spill]] }
   0xf   :  { %v76_v2 = vld [vmem:[%s3438_s0] sm:$0xff]  ;;  %81 = vperm.xlu0 %2468, %v74_v1   ;;  %v77_v6 = vld [vmem:[%s3438_s0 + $0x8] sm:$0xff]  ;;  %v209_v38 = vadd.f32 %v2511_v34, %v208_v37 }
  0x10   :  { %87 = vperm.xlu1 %2469, %v76_v2   ;;  %v2438_v3 = vld [vmem:[%s3439_s7 + $0x38] sm:$0xff]  ;;  %v2437_v4 = vld [vmem:[%s3439_s7 + $0x30] sm:$0xff]  ;;  %v2436_v7 = vld [vmem:[%s3439_s7 + $0x28] sm:$0xff] }
  0x11   :  { %166 = vmatpush.bf16.msra.mxu0 %v2438_v3  ;;  %v2435_v8 = vld [vmem:[%s3439_s7 + $0x20] sm:$0xff]  ;;  %v2434_v9 = vld [vmem:[%s3439_s7 + $0x18] sm:$0xff]  ;;  %v2433_v10 = vld [vmem:[%s3439_s7 + $0x10] sm:$0xff]  ;;  %v2799_v39 = vsel %vm210_vm7, %v2511_v34, %v209_v38  ;;  %vm305_vm7 = vcmask 1041408  }
  0x12   :  { %v2432_v11 = vld [vmem:[%s3439_s7 + $0x8] sm:$0xff]  ;;  %v2431_v12 = vld [vmem:[%s3439_s7] sm:$0xff] }
  0x13   :  { %v185_v20 = vld [vmem:[%s3440_s5] sm:$0xff]  ;;  %s2636_s5 = smov 64  }
  0x15   :  { %167 = vmatpush.bf16.msra.mxu0 %v2437_v4 }
  0x17   :  { %84 = vperm.xlu0 %2468, %v75_v5  }
  0x18   :  { %90 = vperm.xlu1 %2469, %v77_v6  }
  0x19   :  { %168 = vmatpush.bf16.msra.mxu0 %v2436_v7 }
  0x1d   :  { %169 = vmatpush.bf16.msra.mxu0 %v2435_v8 }
  0x21   :  { %170 = vmatpush.bf16.msra.mxu0 %v2434_v9 }
  0x25   :  { %171 = vmatpush.bf16.msra.mxu0 %v2433_v10 }
  0x29   :  { %172 = vmatpush.bf16.msra.mxu0 %v2432_v11 }
  0x2d   :  { %173 = vmatpush.bf16.msra.mxu0 %v2431_v12 }
  0x81   :  { %v82_v13 = vpop.permute.xlu0 %81 }
  0x82   :  { %v88_v17 = vpop.permute.xlu1 %87  ;;  %vm92_vm0 = vcmp.eq.s32.totalorder %v82_v13, %v79_v15 }
  0x83   :  { %vm94_vm3 = vcmp.eq.s32.totalorder %v88_v17, %v79_v15 }
  0x89   :  { %v85_v16 = vpop.permute.xlu0 %84 }
  0x8a   :  { %vm93_vm1 = vcmp.eq.s32.totalorder %v85_v16, %v79_v15  ;;  %v91_v19 = vpop.permute.xlu1 %90 }
  0x8b   :  { %vm2271_vm2 = vmpackc.low %vm93_vm1, %vm92_vm0  ;;  %vm95_vm4 = vcmp.eq.s32.totalorder %v91_v19, %v79_v15 }
  0x8c   :  { %2272 = vmatmul.msk.bf16.vlgmr.msra.gmra.mxu0 %vm2271_vm2, %v2633_v18  ;;  %vm2273_vm5 = vmpackc.low %vm95_vm4, %vm94_vm3  ;;  %vm378_vm4 = vcmask 130048  }
  0x9c   :  { %2274 = vmatmul.msk.bf16.gmra.mxu0 %vm2273_vm5, %v2633_v18  ;;  %vm524_vm5 = vcmask 1043456  }
 0x109   :  { %v175_v21 = vpop.f32.mrf.mxu0 }
 0x10a   :  { %v186_v22 = vadd.f32 %v185_v20, %v175_v21 }
 0x10c   :  { %v193_v23 = vsel %vm192_vm6, %v186_v22, 0.0 }
 0x10d   :  { %194 = vadd.xlane.f32.xlu2 %v193_v23 }
 0x111   :  { %v177_v24 = vpop.f32.mrf.mxu0 }
 0x112   :  { %v187_v25 = vadd.f32 %v185_v20, %v177_v24  ;;  %v2490_v24 = vld [vmem:[%s3441_s29] ss:$0 sm:$0xff] }
 0x114   :  { %v196_v26 = vsel %vm192_vm6, %v187_v25, 0.0 }
 0x115   :  { %197 = vadd.xlane.f32.xlu2 %v196_v26 }
 0x119   :  { %v180_v27 = vpop.f32.mrf.mxu0 }
 0x11a   :  { %v188_v28 = vadd.f32 %v185_v20, %v180_v27 }
 0x11c   :  { %v199_v29 = vsel %vm192_vm6, %v188_v28, 0.0 }
 0x11d   :  { %200 = vadd.xlane.f32.xlu0 %v199_v29 }
 0x121   :  { %v182_v30 = vpop.f32.mrf.mxu0 }
 0x122   :  { %v189_v31 = vadd.f32 %v185_v20, %v182_v30 }
 0x124   :  { %v202_v32 = vsel %vm192_vm6, %v189_v31, 0.0 }
 0x125   :  { %203 = vadd.xlane.f32.xlu1 %v202_v32 }
 0x180   :  { %v195_v40 = vpop.xlane.xlu2 %194 }
 0x181   :  { %v212_v41 = vmul.f32 %v2799_v39, %v195_v40 }
 0x183   :  { %v216_v42 = vsub.f32 %v186_v22, %v212_v41 }
 0x185   :  { %v220_v43 = vmul.f32 %v216_v42, %v216_v42 }
 0x187   :  { %v224_v44 = vsel %vm192_vm6, %v220_v43, 0.0 }
 0x188   :  { %225 = vadd.xlane.f32.xlu2 %v224_v44  ;;  %v198_v45 = vpop.xlane.xlu2 %197 }
 0x189   :  { %v213_v46 = vmul.f32 %v2799_v39, %v198_v45 }
 0x18b   :  { %v2804_v47 = vsub.f32 %v187_v25, %v213_v46 }
 0x18d   :  { %v221_v48 = vmul.f32 %v2804_v47, %v2804_v47 }
 0x18f   :  { %v227_v49 = vsel %vm192_vm6, %v221_v48, 0.0 }
 0x190   :  { %228 = vadd.xlane.f32.xlu2 %v227_v49  ;;  %v201_v50 = vpop.xlane.xlu0 %200 }
 0x191   :  { %v214_v51 = vmul.f32 %v2799_v39, %v201_v50 }
 0x193   :  { %v2810_v52 = vsub.f32 %v188_v28, %v214_v51 }
 0x195   :  { %v222_v53 = vmul.f32 %v2810_v52, %v2810_v52 }
 0x197   :  { %v230_v54 = vsel %vm192_vm6, %v222_v53, 0.0 }
 0x198   :  { %231 = vadd.xlane.f32.xlu2 %v230_v54  ;;  %v204_v55 = vpop.xlane.xlu1 %203 }
 0x199   :  { %v215_v56 = vmul.f32 %v2799_v39, %v204_v55 }
 0x19b   :  { %v2816_v57 = vsub.f32 %v189_v31, %v215_v56  ;;  %v2491_v31 = vld [vmem:[%s3442_s9] ss:$0 sm:$0xff] }
 0x19d   :  { %v223_v58 = vmul.f32 %v2816_v57, %v2816_v57 }
 0x19f   :  { %v233_v59 = vsel %vm192_vm6, %v223_v58, 0.0 }
 0x1a0   :  { %234 = vadd.xlane.f32.xlu2 %v233_v59 }
 0x1fb   :  { %v226_v61 = vpop.xlane.xlu2 %225 }
 0x1fc   :  { %v236_v62 = vmul.f32 %v226_v61, %v2799_v39 }
 0x1fe   :  { %v240_v0 = vadd.f32 1e-05, %v236_v62 }
 0x200   :  { %2512 = vrsqrt.f32 %v240_v0  ;;  %vm250_vm9 = vweird.f32 %v240_v0 }
 0x203   :  { %v229_v1 = vpop.xlane.xlu2 %228 }
 0x204   :  { %v237_v2 = vmul.f32 %v229_v1, %v2799_v39 }
 0x206   :  { %v2513_v3 = vpop.eup %2512  ;;  %v241_v4 = vadd.f32 1e-05, %v237_v2 }
 0x207   :  { %v245_v5 = vmul.f32 %v2513_v3, %v240_v0  ;;  %vm251_vm8 = vweird.f32 %v2513_v3 }
 0x208   :  { %2514 = vrsqrt.f32 %v241_v4  ;;  %vm252_vm10 = vmor %vm250_vm9, %vm251_vm8  ;;  %vm260_vm12 = vweird.f32 %v241_v4  ;;  %vm470_vm8 = vcmask 64512  }
 0x209   :  { %v246_v6 = vmul.f32 %v2513_v3, %v245_v5 }
 0x20b   :  { %v247_v7 = vmul.f32 0.5, %v246_v6  ;;  %v232_v8 = vpop.xlane.xlu2 %231 }
 0x20c   :  { %v238_v9 = vmul.f32 %v232_v8, %v2799_v39 }
 0x20d   :  { %v248_v10 = vsub.f32 1.5, %v247_v7 }
 0x20e   :  { %v2515_v11 = vpop.eup %2514  ;;  %v242_v12 = vadd.f32 1e-05, %v238_v9 }
 0x20f   :  { %v249_v13 = vmul.f32 %v2513_v3, %v248_v10  ;;  %v255_v14 = vmul.f32 %v2515_v11, %v241_v4  ;;  %vm261_vm11 = vweird.f32 %v2515_v11 }
 0x210   :  { %2516 = vrsqrt.f32 %v242_v12  ;;  %vm262_vm13 = vmor %vm260_vm12, %vm261_vm11  ;;  %vm270_vm15 = vweird.f32 %v242_v12 }
 0x211   :  { %v256_v15 = vmul.f32 %v2515_v11, %v255_v14  ;;  %v253_v16 = vsel %vm252_vm10, %v2513_v3, %v249_v13 }
 0x212   :  { %v284_v22 = vmul.f32 %v253_v16, %v216_v42 }
 0x213   :  { %v257_v17 = vmul.f32 0.5, %v256_v15  ;;  %v235_v18 = vpop.xlane.xlu2 %234 }
 0x214   :  { %v239_v19 = vmul.f32 %v235_v18, %v2799_v39  ;;  %v291_v30 = vmul.f32 %v2490_v24, %v284_v22 }
 0x215   :  { %v258_v20 = vsub.f32 1.5, %v257_v17 }
 0x216   :  { %v2517_v21 = vpop.eup %2516  ;;  %v243_v23 = vadd.f32 1e-05, %v239_v19  ;;  %v2838_v36 = vadd.f32 %v2491_v31, %v291_v30 }
 0x217   :  { %v259_v25 = vmul.f32 %v2515_v11, %v258_v20  ;;  %v265_v26 = vmul.f32 %v2517_v21, %v242_v12  ;;  %vm271_vm14 = vweird.f32 %v2517_v21 }
 0x218   :  { %2518 = vrsqrt.f32 %v243_v23  ;;  %vm272_vm0 = vmor %vm270_vm15, %vm271_vm14  ;;  %vm280_vm2 = vweird.f32 %v243_v23 }
 0x219   :  { %v263_v27 = vsel %vm262_vm13, %v2515_v11, %v259_v25  ;;  %v266_v28 = vmul.f32 %v2517_v21, %v265_v26  ;;  %v302_v26 = vld [vmem:[%s3412_s2] sm:$0x3]  ;;  %s2638_s2 = smov 112  }
 0x21a   :  { %v285_v29 = vmul.f32 %v263_v27, %v2804_v47 }
 0x21b   :  { %v267_v32 = vmul.f32 0.5, %v266_v28 }
 0x21c   :  { %v292_v33 = vmul.f32 %v2490_v24, %v285_v29 }
 0x21d   :  { %v268_v34 = vsub.f32 1.5, %v267_v32 }
 0x21e   :  { %v2519_v35 = vpop.eup %2518  ;;  %v2840_v37 = vadd.f32 %v2491_v31, %v292_v33 }
 0x21f   :  { %v269_v38 = vmul.f32 %v2517_v21, %v268_v34  ;;  %v275_v40 = vmul.f32 %v2519_v35, %v243_v23  ;;  %vm281_vm1 = vweird.f32 %v2519_v35 }
 0x220   :  { %v322_v41 = vpack.c.bf16 %v2840_v37, %v2838_v36  ;;  %vm282_vm3 = vmor %vm280_vm2, %vm281_vm1 }
 0x221   :  { %v276_v42 = vmul.f32 %v2519_v35, %v275_v40  ;;  %v273_v43 = vsel %vm272_vm0, %v2517_v21, %v269_v38 }
 0x222   :  { %2283 = vmatmul.msk.bf16.vlgmr.msra.gmra.mxu1 %vm192_vm6, %v322_v41  ;;  %v286_v46 = vmul.f32 %v273_v43, %v2810_v52  ;;  %v2492_v52 = vld [vmem:[%s3443_s4] ss:$0 sm:$0xff] }
 0x223   :  { %v277_v44 = vmul.f32 0.5, %v276_v42 }
 0x224   :  { %v293_v50 = vmul.f32 %v2490_v24, %v286_v46 }
 0x225   :  { %v278_v45 = vsub.f32 1.5, %v277_v44 }
 0x226   :  { %v2847_v53 = vadd.f32 %v2491_v31, %v293_v50 }
 0x227   :  { %v279_v47 = vmul.f32 %v2519_v35, %v278_v45 }
 0x229   :  { %v283_v48 = vsel %vm282_vm3, %v2519_v35, %v279_v47 }
 0x22a   :  { %v287_v49 = vmul.f32 %v283_v48, %v2816_v57 }
 0x22c   :  { %v294_v51 = vmul.f32 %v2490_v24, %v287_v49  ;;  %v303_v24 = vld [vmem:[%s3411_s3] sm:$0x3]  ;;  %s2637_s3 = smov 80  }
 0x22d   :  { %v304_v25 = vrot.slane %v303_v24, 6 }
 0x22e   :  { %v2849_v54 = vadd.f32 %v2491_v31, %v294_v51 }
 0x22f   :  { %v306_v27 = vsel %vm305_vm7, %v302_v26, %v304_v25 }
 0x230   :  { %v323_v55 = vpack.c.bf16 %v2849_v54, %v2847_v53  ;;  %v307_v28 = vcvt.s32.f32 %v306_v27 }
 0x232   :  { %2284 = vmatmul.msk.bf16.gmra.mxu1 %vm192_vm6, %v323_v55  ;;  %v308_v29 = vsub.f32 1.0, %v307_v28 }
 0x234   :  { %v309_v30 = vmul.f32 -1e+09, %v308_v29 }
 0x236   :  { %v2893_v31 = vperm.slane %v309_v30, 0  ;;  %v311_v38 = vrot.slane %v309_v30, 1  ;;  %v312_v43 = vrot.slane %v309_v30, 2 }
 0x238   :  { %v2899_v40 = vperm.slane %v311_v38, 0  ;;  %v2903_v45 = vperm.slane %v312_v43, 0 }
 0x29f   :  { %v359_v56 = vpop.f32.mrf.mxu1 }
 0x2a0   :  { %v360_v58 = vadd.f32 %v2492_v52, %v359_v56 }
 0x2a2   :  { %v369_v59 = vpack.c.bf16 %v360_v58, %v360_v58 }
 0x2a4   :  { %v374_v60 = vunpack.c.l.b16 %v369_v59 }
 0x2a6   :  { %v2857_v57 = vpack.c.b16 %v374_v60, %v374_v60 }
 0x2a7   :  { %v361_v61 = vpop.f32.mrf.mxu1 }
 0x2a8   :  { %v362_v62 = vadd.f32 %v2492_v52, %v361_v61  ;;  %376 = vrot.lane.b32.xlu2 %v2857_v57, %s2635_s27 }
 0x2aa   :  { %v370_v63 = vpack.c.bf16 %v362_v62, %v362_v62 }
 0x2ac   :  { %v399_v0 = vunpack.c.l.b16 %v370_v63 }
 0x2ae   :  { %v2861_v1 = vpack.c.b16 %v399_v0, %v399_v0 }
 0x2af   :  { %v364_v2 = vpop.f32.mrf.mxu1 }
 0x2b0   :  { %v365_v3 = vadd.f32 %v2492_v52, %v364_v2  ;;  %401 = vrot.lane.b32.xlu0 %v2861_v1, %s2635_s27 }
 0x2b2   :  { %v371_v4 = vpack.c.bf16 %v365_v3, %v365_v3 }
 0x2b4   :  { %v423_v5 = vunpack.c.l.b16 %v371_v4 }
 0x2b6   :  { %v2865_v6 = vpack.c.b16 %v423_v5, %v423_v5 }
 0x2b7   :  { %v366_v7 = vpop.f32.mrf.mxu1 }
 0x2b8   :  { %v367_v8 = vadd.f32 %v2492_v52, %v366_v7  ;;  %541 = vrot.lane.b32.xlu0 %v2861_v1, %s2636_s5  ;;  %425 = vrot.lane.b32.xlu1 %v2865_v6, %s2635_s27  ;;  %v313_v52 = vrot.slane %v309_v30, 3 }
 0x2ba   :  { %v372_v9 = vpack.c.bf16 %v367_v8, %v367_v8  ;;  %v2911_v56 = vperm.slane %v313_v52, 0 }
 0x2bc   :  { %v447_v10 = vunpack.c.l.b16 %v372_v9 }
 0x2be   :  { %v2871_v11 = vpack.c.b16 %v447_v10, %v447_v10 }
 0x2c0   :  { %449 = vrot.lane.b32.xlu2 %v2871_v11, %s2635_s27 }
 0x2c8   :  { %562 = vrot.lane.b32.xlu2 %v2865_v6, %s2636_s5 }
 0x302   :  { %v377_v12 = vpop.permute.xlu2 %376 }
 0x303   :  { %v383_v13 = vsel %vm378_vm4, %v377_v12, 0 }
 0x304   :  { %392 = vmatpush.bf16.xpose.msra.mxu2 %v383_v13 }
 0x30b   :  { %2285 = vmatmul.msk.bf16.vlgmr.msra.gmra.mxu2 %vm378_vm4, %v369_v59 }
 0x31a   :  { %v450_v14 = vpop.permute.xlu2 %449 }
 0x31b   :  { %v455_v17 = vsel %vm378_vm4, %v450_v14, 0 }
 0x322   :  { %v402_v15 = vpop.permute.xlu0 %401  ;;  %v563_v18 = vpop.permute.xlu2 %562 }
 0x323   :  { %v407_v16 = vsel %vm378_vm4, %v402_v15, 0  ;;  %v568_v21 = vsel %vm524_vm5, %v563_v18, 0 }
 0x324   :  { %416 = vmatpush.bf16.xpose.msra.mxu3 %v407_v16 }
 0x32a   :  { %v542_v19 = vpop.permute.xlu0 %541  ;;  %v426_v20 = vpop.permute.xlu1 %425 }
 0x32b   :  { %v547_v22 = vsel %vm524_vm5, %v542_v19, 0  ;;  %2286 = vmatmul.msk.bf16.vlgmr.msra.gmra.mxu3 %vm378_vm4, %v370_v63  ;;  %v431_v23 = vsel %vm378_vm4, %v426_v20, 0 }
 0x32c   :  { %464 = vmatpush.bf16.xpose.msrb.mxu3 %v455_v17  ;;  %440 = vmatpush.bf16.xpose.msrb.mxu2 %v431_v23 }
 0x333   :  { %2287 = vmatmul.msk.bf16.vlgmr.msrb.gmra.mxu2 %vm378_vm4, %v371_v4 }
 0x334   :  { %577 = vmatpush.bf16.msra.mxu3 %v568_v21  ;;  %556 = vmatpush.bf16.msra.mxu2 %v547_v22 }
 0x33b   :  { %2288 = vmatmul.msk.bf16.vlgmr.msrb.gmra.mxu3 %vm378_vm4, %v372_v9 }
 0x38e   :  { %v394_v32 = vpop.f32.mrf.mxu2 }
 0x38f   :  { %v395_v33 = vadd.f32 %v394_v32, %v2893_v31 }
 0x391   :  { %v471_v34 = vsel %vm470_vm8, %v395_v33, -inf }
 0x392   :  { %472 = vmax.xlane.f32.xlu1 %v471_v34 }
 0x396   :  { %v396_v35 = vpop.f32.mrf.mxu2 }
 0x3ab   :  { %606 = vrot.lane.b32.xlu1 %v2857_v57, %s2637_s3 }
 0x3ae   :  { %v418_v41 = vpop.f32.mrf.mxu3 }
 0x3af   :  { %v419_v42 = vadd.f32 %v418_v41, %v2899_v40 }
 0x3b1   :  { %v474_v44 = vsel %vm470_vm8, %v419_v42, -inf }
 0x3b2   :  { %475 = vmax.xlane.f32.xlu0 %v474_v44 }
 0x3b6   :  { %v420_v46 = vpop.f32.mrf.mxu3  ;;  %v442_v47 = vpop.f32.mrf.mxu2 }
 0x3b7   :  { %v443_v48 = vadd.f32 %v442_v47, %v2903_v45 }
 0x3b9   :  { %v477_v49 = vsel %vm470_vm8, %v443_v48, -inf }
 0x3ba   :  { %478 = vmax.xlane.f32.xlu2 %v477_v49 }
 0x3be   :  { %v444_v50 = vpop.f32.mrf.mxu2  ;;  %v466_v51 = vpop.f32.mrf.mxu3 }
 0x3bf   :  { %v467_v58 = vadd.f32 %v466_v51, %v2911_v56 }
 0x3c1   :  { %v480_v59 = vsel %vm470_vm8, %v467_v58, -inf }
 0x3c6   :  { %629 = vrot.lane.b32.xlu0 %v2861_v1, %s2637_s3  ;;  %v468_v55 = vpop.f32.mrf.mxu3 }
 0x3d2   :  { %519 = vrot.lane.b32.xlu2 %v2857_v57, %s2636_s5 }
 0x3f0   :  { %481 = vmax.xlane.f32.xlu0 %v480_v59 }
 0x404   :  { %604 = vrot.lane.b32.xlu0 %v2857_v57, %s2638_s2 }
 0x405   :  { %v473_v60 = vpop.xlane.xlu1 %472 }
 0x406   :  { %v483_v61 = vsub.f32 %v395_v33, %v473_v60 }
 0x408   :  { %v487_v62 = vmul.f32 1.442695, %v483_v61 }
 0x40a   :  { %2520 = vpow2.f32 %v487_v62 }
 0x410   :  { %v2521_v63 = vpop.eup %2520 }
 0x411   :  { %v495_v0 = vsel %vm470_vm8, %v2521_v63, 0.0 }
 0x412   :  { %496 = vadd.xlane.f32.xlu1 %v495_v0 }
 0x41d   :  { %v607_v2 = vpop.permute.xlu1 %606 }
 0x41e   :  { %v612_v3 = vsel %vm378_vm4, %v607_v2, 0 }
 0x41f   :  { %621 = vmatpush.bf16.xpose.msrb.mxu2 %v612_v3 }
 0x425   :  { %v476_v4 = vpop.xlane.xlu0 %475 }
 0x426   :  { %v484_v5 = vsub.f32 %v419_v42, %v476_v4 }
 0x428   :  { %v489_v7 = vmul.f32 1.442695, %v484_v5 }
 0x42a   :  { %2522 = vpow2.f32 %v489_v7 }
 0x42d   :  { %v479_v8 = vpop.xlane.xlu2 %478 }
 0x42e   :  { %v485_v9 = vsub.f32 %v443_v48, %v479_v8 }
 0x430   :  { %v2523_v10 = vpop.eup %2522  ;;  %v491_v12 = vmul.f32 1.442695, %v485_v9 }
 0x431   :  { %v498_v13 = vsel %vm470_vm8, %v2523_v10, 0.0 }
 0x432   :  { %2524 = vpow2.f32 %v491_v12  ;;  %499 = vadd.xlane.f32.xlu2 %v498_v13 }
 0x435   :  { %v520_v14 = vpop.permute.xlu2 %519 }
 0x436   :  { %v526_v15 = vsel %vm524_vm5, %v520_v14, 0 }
 0x437   :  { %535 = vmatpush.bf16.msrb.mxu1 %v526_v15 }
 0x438   :  { %v2525_v16 = vpop.eup %2524  ;;  %v630_v17 = vpop.permute.xlu0 %629 }
 0x439   :  { %v635_v18 = vsel %vm378_vm4, %v630_v17, 0  ;;  %v501_v19 = vsel %vm470_vm8, %v2525_v16, 0.0 }
 0x43a   :  { %644 = vmatpush.bf16.xpose.msrb.mxu3 %v635_v18  ;;  %502 = vadd.xlane.f32.xlu1 %v501_v19 }
 0x44a   :  { %627 = vrot.lane.b32.xlu2 %v2861_v1, %s2638_s2 }
 0x452   :  { %652 = vrot.lane.b32.xlu2 %v2865_v6, %s2637_s3 }
 0x453   :  { %583 = vrot.lane.b32.xlu1 %v2871_v11, %s2636_s5 }
 0x45a   :  { %675 = vrot.lane.b32.xlu2 %v2871_v11, %s2637_s3 }
 0x45b   :  { %650 = vrot.lane.b32.xlu1 %v2865_v6, %s2638_s2 }
 0x463   :  { %v482_v20 = vpop.xlane.xlu0 %481  ;;  %673 = vrot.lane.b32.xlu1 %v2871_v11, %s2638_s2 }
 0x464   :  { %v486_v21 = vsub.f32 %v467_v58, %v482_v20 }
 0x466   :  { %v493_v22 = vmul.f32 1.442695, %v486_v21 }
 0x468   :  { %2526 = vpow2.f32 %v493_v22 }
 0x46e   :  { %v2527_v23 = vpop.eup %2526 }
 0x46f   :  { %v504_v24 = vsel %vm470_vm8, %v2527_v23, 0.0 }
 0x470   :  { %505 = vadd.xlane.f32.xlu0 %v504_v24 }
 0x476   :  { %v605_v43 = vpop.permute.xlu0 %604 }
 0x485   :  { %v497_v25 = vpop.xlane.xlu1 %496 }
 0x486   :  { %2528 = vrcp.f32 %v497_v25 }
 0x48c   :  { %v2529_v26 = vpop.eup %2528 }
 0x48d   :  { %v511_v27 = vmul.f32 %v2529_v26, %v2521_v63 }
 0x48f   :  { %v515_v28 = vpack.c.bf16 %v511_v27, %v511_v27 }
 0x491   :  { %2289 = vmatmul.msk.bf16.vlgmr.msrb.gmra.mxu1 %vm470_vm8, %v515_v28 }
 0x4a5   :  { %v500_v29 = vpop.xlane.xlu2 %499 }
 0x4a6   :  { %2530 = vrcp.f32 %v500_v29 }
 0x4ac   :  { %v2531_v30 = vpop.eup %2530 }
 0x4ad   :  { %v512_v32 = vmul.f32 %v2531_v30, %v2523_v10  ;;  %v503_v33 = vpop.xlane.xlu1 %502  ;;  %v628_v42 = vpop.permute.xlu2 %627 }
 0x4ae   :  { %2532 = vrcp.f32 %v503_v33 }
 0x4af   :  { %v516_v34 = vpack.c.bf16 %v512_v32, %v512_v32 }
 0x4b1   :  { %2290 = vmatmul.msk.bf16.vlgmr.msra.gmra.mxu2 %vm470_vm8, %v516_v34 }
 0x4b4   :  { %v2533_v35 = vpop.eup %2532 }
 0x4b5   :  { %v513_v38 = vmul.f32 %v2533_v35, %v2525_v16  ;;  %v653_v44 = vpop.permute.xlu2 %652 }
 0x4b6   :  { %v658_v48 = vsel %vm378_vm4, %v653_v44, 0 }
 0x4b7   :  { %v517_v41 = vpack.c.bf16 %v513_v38, %v513_v38 }
 0x4b9   :  { %2291 = vmatmul.msk.bf16.vlgmr.msra.gmra.mxu3 %vm470_vm8, %v517_v41 }
 0x4bd   :  { %v676_v55 = vpop.permute.xlu2 %675 }
 0x4be   :  { %v681_v58 = vsel %vm378_vm4, %v676_v55, 0 }
 0x4c1   :  { %2293 = vmatmul.msk.bf16.vlgmr.msrb.gmra.mxu2 %vm378_vm4, %v605_v43 }
 0x4c5   :  { %v584_v46 = vpop.permute.xlu1 %583 }
 0x4c6   :  { %v589_v47 = vsel %vm524_vm5, %v584_v46, 0 }
 0x4c7   :  { %598 = vmatpush.bf16.msra.mxu1 %v589_v47 }
 0x4c9   :  { %2294 = vmatmul.msk.bf16.vlgmr.msrb.gmra.mxu3 %vm378_vm4, %v628_v42 }
 0x4cb   :  { %667 = vmatpush.bf16.xpose.msrb.mxu1 %v658_v48 }
 0x4cd   :  { %v651_v59 = vpop.permute.xlu1 %650 }
 0x4d5   :  { %v674_v60 = vpop.permute.xlu1 %673 }
 0x4e3   :  { %v506_v49 = vpop.xlane.xlu0 %505 }
 0x4e4   :  { %2534 = vrcp.f32 %v506_v49 }
 0x4ea   :  { %v2535_v50 = vpop.eup %2534 }
 0x4eb   :  { %v514_v51 = vmul.f32 %v2535_v50, %v2527_v23 }
 0x4ed   :  { %v518_v52 = vpack.c.bf16 %v514_v51, %v514_v51 }
 0x4ef   :  { %2292 = vmatmul.msk.bf16.vlgmr.msra.gmra.mxu1 %vm470_vm8, %v518_v52 }
 0x4f0   :  { %690 = vmatpush.bf16.xpose.msra.mxu1 %v681_v58 }
 0x4ff   :  { %2295 = vmatmul.msk.bf16.vlgmr.msrb.gmra.mxu1 %vm378_vm4, %v651_v59 }
 0x50e   :  { %v2946_v61 = vpop.f32.mrf.mxu1 }
 0x50f   :  { %2296 = vmatmul.msk.bf16.vlgmr.msra.gmra.mxu1 %vm378_vm4, %v674_v60 }
 0x516   :  { %v539_v62 = vpop.f32.mrf.mxu1 }
 0x534   :  { %v2949_v63 = vpop.f32.mrf.mxu2 }
 0x53c   :  { %v560_v0 = vpop.f32.mrf.mxu2  ;;  %v2951_v2 = vpop.f32.mrf.mxu3 }
 0x544   :  { %v581_v3 = vpop.f32.mrf.mxu3  ;;  %v623_v4 = vpop.f32.mrf.mxu2 }
 0x545   :  { %v624_v5 = vadd.f32 %v623_v4, %v2893_v31 }
 0x547   :  { %v696_v7 = vsel %vm470_vm8, %v624_v5, -inf }
 0x548   :  { %697 = vmax.xlane.f32.xlu2 %v696_v7 }
 0x54c   :  { %v625_v8 = vpop.f32.mrf.mxu2  ;;  %v646_v9 = vpop.f32.mrf.mxu3 }
 0x54d   :  { %v647_v10 = vadd.f32 %v646_v9, %v2899_v40 }
 0x54f   :  { %v699_v12 = vsel %vm470_vm8, %v647_v10, -inf }
 0x550   :  { %700 = vmax.xlane.f32.xlu1 %v699_v12 }
 0x554   :  { %v648_v13 = vpop.f32.mrf.mxu3 }
 0x569   :  { %765 = vrot.lane.b32.xlu1 %v2861_v1, %s2639_s23 }
 0x56c   :  { %v2959_v14 = vpop.f32.mrf.mxu1 }
 0x574   :  { %v602_v15 = vpop.f32.mrf.mxu1 }
 0x57c   :  { %v669_v16 = vpop.f32.mrf.mxu1 }
 0x57d   :  { %v670_v17 = vadd.f32 %v669_v16, %v2903_v45 }
 0x57f   :  { %v702_v18 = vsel %vm470_vm8, %v670_v17, -inf }
 0x580   :  { %703 = vmax.xlane.f32.xlu0 %v702_v18 }
 0x584   :  { %v671_v19 = vpop.f32.mrf.mxu1 }
 0x58c   :  { %v692_v20 = vpop.f32.mrf.mxu1 }
 0x58d   :  { %v693_v21 = vadd.f32 %v692_v20, %v2911_v56 }
 0x58f   :  { %v705_v22 = vsel %vm470_vm8, %v693_v21, -inf }
 0x590   :  { %706 = vmax.xlane.f32.xlu0 %v705_v22  ;;  %v2442_v22 = vld [vmem:[%s3413_s10 + $0x8] sm:$0xff] }
 0x594   :  { %v694_v23 = vpop.f32.mrf.mxu1 }
 0x5bb   :  { %v698_v24 = vpop.xlane.xlu2 %697 }
 0x5bc   :  { %v708_v25 = vsub.f32 %v624_v5, %v698_v24 }
 0x5be   :  { %v712_v1 = vmul.f32 1.442695, %v708_v25 }
 0x5c0   :  { %2536 = vpow2.f32 %v712_v1 }
 0x5c3   :  { %v701_v26 = vpop.xlane.xlu1 %700 }
 0x5c4   :  { %v709_v27 = vsub.f32 %v647_v10, %v701_v26 }
 0x5c6   :  { %v2537_v28 = vpop.eup %2536  ;;  %v714_v29 = vmul.f32 1.442695, %v709_v27  ;;  %v2441_v27 = vld [vmem:[%s3413_s10] sm:$0xff] }
 0x5c7   :  { %v720_v30 = vsel %vm470_vm8, %v2537_v28, 0.0 }
 0x5c8   :  { %2538 = vpow2.f32 %v714_v29  ;;  %721 = vadd.xlane.f32.xlu0 %v720_v30 }
 0x5ce   :  { %v2539_v32 = vpop.eup %2538 }
 0x5cf   :  { %v723_v33 = vsel %vm470_vm8, %v2539_v32, 0.0 }
 0x5d0   :  { %724 = vadd.xlane.f32.xlu2 %v723_v33 }
 0x5db   :  { %v766_v34 = vpop.permute.xlu1 %765 }
 0x5dc   :  { %v771_v35 = vsel %vm524_vm5, %v766_v34, 0  ;;  %744 = vrot.lane.b32.xlu0 %v2857_v57, %s2639_s23 }
 0x5dd   :  { %780 = vmatpush.bf16.msra.mxu3 %v771_v35 }
 0x5e4   :  { %786 = vrot.lane.b32.xlu0 %v2865_v6, %s2639_s23 }
 0x5f3   :  { %v704_v38 = vpop.xlane.xlu0 %703 }
 0x5f4   :  { %v710_v41 = vsub.f32 %v670_v17, %v704_v38 }
 0x5f6   :  { %v716_v42 = vmul.f32 1.442695, %v710_v41 }
 0x5f8   :  { %2540 = vpow2.f32 %v716_v42 }
 0x5fe   :  { %v2541_v43 = vpop.eup %2540 }
 0x5ff   :  { %v726_v44 = vsel %vm470_vm8, %v2541_v43, 0.0 }
 0x600   :  { %727 = vadd.xlane.f32.xlu2 %v726_v44 }
 0x603   :  { %v707_v46 = vpop.xlane.xlu0 %706 }
 0x604   :  { %v711_v47 = vsub.f32 %v693_v21, %v707_v46 }
 0x606   :  { %v718_v48 = vmul.f32 1.442695, %v711_v47 }
 0x608   :  { %2542 = vpow2.f32 %v718_v48 }
 0x60e   :  { %v2543_v49 = vpop.eup %2542 }
 0x60f   :  { %v729_v50 = vsel %vm470_vm8, %v2543_v49, 0.0 }
 0x610   :  { %730 = vadd.xlane.f32.xlu2 %v729_v50 }
 0x628   :  { %807 = vrot.lane.b32.xlu2 %v2871_v11, %s2639_s23 }
 0x63b   :  { %v722_v57 = vpop.xlane.xlu0 %721 }
 0x63c   :  { %2544 = vrcp.f32 %v722_v57 }
 0x642   :  { %v2545_v51 = vpop.eup %2544 }
 0x643   :  { %v725_v6 = vpop.xlane.xlu2 %724  ;;  %v736_v58 = vmul.f32 %v2545_v51, %v2537_v28 }
 0x644   :  { %2546 = vrcp.f32 %v725_v6 }
 0x645   :  { %v740_v0 = vpack.c.bf16 %v736_v58, %v736_v58 }
 0x64a   :  { %v2547_v55 = vpop.eup %2546 }
 0x64b   :  { %v737_v52 = vmul.f32 %v2547_v55, %v2539_v32 }
 0x64d   :  { %v741_v59 = vpack.c.bf16 %v737_v52, %v737_v52 }
 0x64e   :  { %v745_v60 = vpop.permute.xlu0 %744 }
 0x64f   :  { %v750_v62 = vsel %vm524_vm5, %v745_v60, 0  ;;  %2298 = vmatmul.msk.bf16.vlgmr.msra.gmra.mxu3 %vm470_vm8, %v741_v59 }
 0x650   :  { %759 = vmatpush.bf16.msra.mxu2 %v750_v62 }
 0x653   :  { %2297 = vmatmul.msk.bf16.vlgmr.msra.gmra.mxu2 %vm470_vm8, %v740_v0 }
 0x654   :  { %882 = vmatpush.bf16.msrb.mxu2 %v2442_v22 }
 0x656   :  { %v787_v3 = vpop.permute.xlu0 %786 }
 0x657   :  { %v792_v11 = vsel %vm524_vm5, %v787_v3, 0 }
 0x658   :  { %801 = vmatpush.bf16.msrb.mxu0 %v792_v11  ;;  %883 = vmatpush.bf16.msrb.mxu2 %v2441_v27 }
 0x673   :  { %v728_v4 = vpop.xlane.xlu2 %727 }
 0x674   :  { %2548 = vrcp.f32 %v728_v4 }
 0x67a   :  { %v2549_v5 = vpop.eup %2548 }
 0x67b   :  { %v738_v7 = vmul.f32 %v2549_v5, %v2541_v43 }
 0x67d   :  { %v742_v8 = vpack.c.bf16 %v738_v7, %v738_v7 }
 0x67f   :  { %2299 = vmatmul.msk.bf16.vlgmr.msrb.gmra.mxu0 %vm470_vm8, %v742_v8 }
 0x683   :  { %v731_v9 = vpop.xlane.xlu2 %730 }
 0x684   :  { %2550 = vrcp.f32 %v731_v9 }
 0x68a   :  { %v2551_v10 = vpop.eup %2550 }
 0x68b   :  { %v739_v12 = vmul.f32 %v2551_v10, %v2543_v49  ;;  %v808_v13 = vpop.permute.xlu2 %807 }
 0x68c   :  { %v813_v15 = vsel %vm524_vm5, %v808_v13, 0 }
 0x68d   :  { %v743_v16 = vpack.c.bf16 %v739_v12, %v739_v12  ;;  %822 = vmatpush.bf16.msrb.mxu1 %v813_v15 }
 0x690   :  { %2300 = vmatmul.msk.bf16.vlgmr.msrb.gmra.mxu1 %vm470_vm8, %v743_v16 }
 0x6d2   :  { %v782_v17 = vpop.f32.mrf.mxu3 }
 0x6d6   :  { %v761_v18 = vpop.f32.mrf.mxu2 }
 0x6d7   :  { %v2470_v19 = vpack.i.bf16 %v782_v17, %v761_v18 }
 0x6d9   :  { %2471 = vrot.lane.b32.xlu1 %v2470_v19, %s2640_s1  ;;  %v2444_v19 = vld [vmem:[%s3418_s14 + $0x8] sm:$0xff] }
 0x6da   :  { %v784_v20 = vpop.f32.mrf.mxu3  ;;  %1037 = vmatpush.bf16.msrb.mxu3 %v2444_v19 }
 0x6de   :  { %v763_v21 = vpop.f32.mrf.mxu2 }
 0x6fc   :  { %v803_v23 = vpop.f32.mrf.mxu0 }
 0x704   :  { %v805_v24 = vpop.f32.mrf.mxu0 }
 0x70d   :  { %v824_v25 = vpop.f32.mrf.mxu1 }
 0x70e   :  { %v2475_v1 = vpack.i.bf16 %v824_v25, %v803_v23  ;;  %v2443_v23 = vld [vmem:[%s3418_s14] sm:$0xff] }
 0x70f   :  { %1038 = vmatpush.bf16.msrb.mxu3 %v2443_v23  ;;  %v2445_v23 = vld [vmem:[%s3420_s16] sm:$0xff] }
 0x710   :  { %2476 = vrot.lane.b32.xlu0 %v2475_v1, %s2640_s1 }
 0x715   :  { %v826_v26 = vpop.f32.mrf.mxu1 }
 0x74b   :  { %v2472_v28 = vpop.permute.xlu1 %2471 }
 0x74c   :  { %v2474_v29 = vunpack.i.h.bf16 %v2472_v28  ;;  %v2473_v30 = vunpack.i.l.bf16 %v2472_v28 }
 0x74e   :  { %v845_v32 = vsel %vm378_vm4, %v2949_v63, %v2474_v29  ;;  %v844_v33 = vsel %vm378_vm4, %v2946_v61, %v2473_v30  ;;  %v2493_v63 = vld [vmem:[%s3414_s11] ss:$0 sm:$0xff] }
 0x74f   :  { %v848_v34 = vpack.c.bf16 %v845_v32, %v844_v33 }
 0x751   :  { %2309 = vmatmul.msk.bf16.vlgmr.msrb.gmra.mxu2 %vm192_vm6, %v848_v34 }
 0x782   :  { %v2477_v35 = vpop.permute.xlu0 %2476 }
 0x783   :  { %v2479_v38 = vunpack.i.h.bf16 %v2477_v35  ;;  %v2478_v41 = vunpack.i.l.bf16 %v2477_v35 }
 0x785   :  { %v846_v42 = vsel %vm378_vm4, %v2951_v2, %v2478_v41  ;;  %v847_v43 = vsel %vm378_vm4, %v2959_v14, %v2479_v38 }
 0x786   :  { %v849_v44 = vpack.c.bf16 %v847_v43, %v846_v42  ;;  %v2494_v43 = vld [vmem:[%s3415_s12] ss:$0 sm:$0xff] }
 0x788   :  { %2310 = vmatmul.msk.bf16.gmra.mxu2 %vm192_vm6, %v849_v44 }
 0x7d4   :  { %v885_v61 = vpop.f32.mrf.mxu2 }
 0x7d5   :  { %v886_v46 = vadd.f32 %v2493_v63, %v885_v61 }
 0x7d7   :  { %v895_v47 = vadd.f32 %v886_v46, %v2838_v36  ;;  %v2495_v46 = vld [vmem:[%s3416_s13] ss:$0 sm:$0xff] }
 0x7d9   :  { %v901_v48 = vsel %vm192_vm6, %v895_v47, 0.0 }
 0x7da   :  { %902 = vadd.xlane.f32.xlu1 %v901_v48 }
 0x7dc   :  { %v887_v49 = vpop.f32.mrf.mxu2 }
 0x7dd   :  { %v888_v50 = vadd.f32 %v2493_v63, %v887_v49 }
 0x7df   :  { %v896_v2 = vadd.f32 %v888_v50, %v2840_v37 }
 0x7e1   :  { %v904_v14 = vsel %vm192_vm6, %v896_v2, 0.0 }
 0x7e2   :  { %905 = vadd.xlane.f32.xlu0 %v904_v14 }
 0x80b   :  { %v890_v57 = vpop.f32.mrf.mxu2 }
 0x80c   :  { %v891_v6 = vadd.f32 %v2493_v63, %v890_v57 }
 0x80e   :  { %v897_v51 = vadd.f32 %v891_v6, %v2847_v53 }
 0x810   :  { %v907_v55 = vsel %vm192_vm6, %v897_v51, 0.0 }
 0x811   :  { %908 = vadd.xlane.f32.xlu2 %v907_v55 }
 0x813   :  { %v892_v52 = vpop.f32.mrf.mxu2 }
 0x814   :  { %v893_v58 = vadd.f32 %v2493_v63, %v892_v52 }
 0x816   :  { %v898_v36 = vadd.f32 %v893_v58, %v2849_v54 }
 0x818   :  { %v910_v59 = vsel %vm192_vm6, %v898_v36, 0.0 }
 0x819   :  { %911 = vadd.xlane.f32.xlu1 %v910_v59 }
 0x84d   :  { %v903_v60 = vpop.xlane.xlu1 %902 }
 0x84e   :  { %v913_v37 = vmul.f32 %v903_v60, %v2799_v39 }
 0x850   :  { %v917_v62 = vsub.f32 %v895_v47, %v913_v37 }
 0x852   :  { %v921_v0 = vmul.f32 %v917_v62, %v917_v62 }
 0x854   :  { %v925_v3 = vsel %vm192_vm6, %v921_v0, 0.0 }
 0x855   :  { %926 = vadd.xlane.f32.xlu0 %v925_v3  ;;  %v906_v11 = vpop.xlane.xlu0 %905 }
 0x856   :  { %v914_v53 = vmul.f32 %v906_v11, %v2799_v39 }
 0x858   :  { %v918_v4 = vsub.f32 %v896_v2, %v914_v53 }
 0x85a   :  { %v922_v5 = vmul.f32 %v918_v4, %v918_v4 }
 0x85c   :  { %v928_v7 = vsel %vm192_vm6, %v922_v5, 0.0 }
 0x85d   :  { %929 = vadd.xlane.f32.xlu1 %v928_v7 }
 0x884   :  { %v909_v54 = vpop.xlane.xlu2 %908 }
 0x885   :  { %v915_v8 = vmul.f32 %v909_v54, %v2799_v39 }
 0x887   :  { %v3017_v9 = vsub.f32 %v897_v51, %v915_v8 }
 0x889   :  { %v923_v10 = vmul.f32 %v3017_v9, %v3017_v9 }
 0x88b   :  { %v931_v12 = vsel %vm192_vm6, %v923_v10, 0.0 }
 0x88c   :  { %v912_v13 = vpop.xlane.xlu1 %911  ;;  %932 = vadd.xlane.f32.xlu2 %v931_v12 }
 0x88d   :  { %v916_v15 = vmul.f32 %v912_v13, %v2799_v39 }
 0x88f   :  { %v3023_v16 = vsub.f32 %v898_v36, %v916_v15 }
 0x891   :  { %v924_v17 = vmul.f32 %v3023_v16, %v3023_v16 }
 0x893   :  { %v934_v18 = vsel %vm192_vm6, %v924_v17, 0.0 }
 0x894   :  { %935 = vadd.xlane.f32.xlu0 %v934_v18 }
 0x8c8   :  { %v927_v20 = vpop.xlane.xlu0 %926 }
 0x8c9   :  { %v937_v21 = vmul.f32 %v927_v20, %v2799_v39  ;;  %v2446_v20 = vld [vmem:[%s3420_s16 + $0x8] sm:$0xff] }
 0x8cb   :  { %v941_v22 = vadd.f32 1e-05, %v937_v21  ;;  %v2496_v21 = vld [vmem:[%s3417_s15] ss:$0 sm:$0xff] }
 0x8cd   :  { %2552 = vrsqrt.f32 %v941_v22  ;;  %vm951_vm10 = vweird.f32 %v941_v22 }
 0x8d0   :  { %v930_v24 = vpop.xlane.xlu1 %929 }
 0x8d1   :  { %v938_v25 = vmul.f32 %v930_v24, %v2799_v39 }
 0x8d3   :  { %v2553_v1 = vpop.eup %2552  ;;  %v942_v26 = vadd.f32 1e-05, %v938_v25 }
 0x8d4   :  { %v946_v27 = vmul.f32 %v2553_v1, %v941_v22  ;;  %vm952_vm9 = vweird.f32 %v2553_v1 }
 0x8d5   :  { %2554 = vrsqrt.f32 %v942_v26  ;;  %vm953_vm11 = vmor %vm951_vm10, %vm952_vm9  ;;  %vm961_vm13 = vweird.f32 %v942_v26  ;;  %vm1124_vm9 = vcmask 523264  }
 0x8d6   :  { %v947_v28 = vmul.f32 %v2553_v1, %v946_v27 }
 0x8d8   :  { %v948_v29 = vmul.f32 0.5, %v947_v28 }
 0x8da   :  { %v949_v30 = vsub.f32 1.5, %v948_v29 }
 0x8db   :  { %v2555_v32 = vpop.eup %2554 }
 0x8dc   :  { %v950_v33 = vmul.f32 %v2553_v1, %v949_v30  ;;  %v956_v34 = vmul.f32 %v2555_v32, %v942_v26  ;;  %vm962_vm12 = vweird.f32 %v2555_v32 }
 0x8dd   :  { %vm963_vm14 = vmor %vm961_vm13, %vm962_vm12 }
 0x8de   :  { %v957_v35 = vmul.f32 %v2555_v32, %v956_v34  ;;  %v954_v38 = vsel %vm953_vm11, %v2553_v1, %v950_v33 }
 0x8df   :  { %v985_v44 = vmul.f32 %v954_v38, %v917_v62 }
 0x8e0   :  { %v958_v41 = vmul.f32 0.5, %v957_v35 }
 0x8e1   :  { %v992_v47 = vmul.f32 %v2494_v43, %v985_v44 }
 0x8e2   :  { %v959_v42 = vsub.f32 1.5, %v958_v41 }
 0x8e3   :  { %v3042_v50 = vadd.f32 %v2495_v46, %v992_v47 }
 0x8e4   :  { %v960_v63 = vmul.f32 %v2555_v32, %v959_v42 }
 0x8e6   :  { %v964_v61 = vsel %vm963_vm14, %v2555_v32, %v960_v63 }
 0x8e7   :  { %v986_v48 = vmul.f32 %v964_v61, %v918_v4 }
 0x8e9   :  { %v993_v49 = vmul.f32 %v2494_v43, %v986_v48 }
 0x8eb   :  { %v3044_v2 = vadd.f32 %v2495_v46, %v993_v49 }
 0x8ed   :  { %v1003_v14 = vpack.c.bf16 %v3044_v2, %v3042_v50 }
 0x8ef   :  { %2319 = vmatmul.msk.bf16.vlgmr.msrb.gmra.mxu3 %vm192_vm6, %v1003_v14 }
 0x8ff   :  { %v933_v57 = vpop.xlane.xlu2 %932 }
 0x900   :  { %v939_v6 = vmul.f32 %v933_v57, %v2799_v39 }
 0x902   :  { %v943_v51 = vadd.f32 1e-05, %v939_v6 }
 0x904   :  { %2556 = vrsqrt.f32 %v943_v51  ;;  %vm971_vm0 = vweird.f32 %v943_v51 }
 0x907   :  { %v936_v55 = vpop.xlane.xlu0 %935 }
 0x908   :  { %v940_v52 = vmul.f32 %v936_v55, %v2799_v39 }
 0x90a   :  { %v2557_v58 = vpop.eup %2556  ;;  %v944_v36 = vadd.f32 1e-05, %v940_v52 }
 0x90b   :  { %v966_v59 = vmul.f32 %v2557_v58, %v943_v51  ;;  %vm972_vm15 = vweird.f32 %v2557_v58 }
 0x90c   :  { %2558 = vrsqrt.f32 %v944_v36  ;;  %vm973_vm1 = vmor %vm971_vm0, %vm972_vm15  ;;  %vm981_vm3 = vweird.f32 %v944_v36 }
 0x90d   :  { %v967_v60 = vmul.f32 %v2557_v58, %v966_v59 }
 0x90f   :  { %v968_v37 = vmul.f32 0.5, %v967_v60 }
 0x911   :  { %v969_v62 = vsub.f32 1.5, %v968_v37 }
 0x912   :  { %v2559_v0 = vpop.eup %2558 }
 0x913   :  { %v970_v3 = vmul.f32 %v2557_v58, %v969_v62  ;;  %v976_v11 = vmul.f32 %v2559_v0, %v944_v36  ;;  %vm982_vm2 = vweird.f32 %v2559_v0 }
 0x914   :  { %vm983_vm7 = vmor %vm981_vm3, %vm982_vm2 }
 0x915   :  { %v977_v53 = vmul.f32 %v2559_v0, %v976_v11  ;;  %v974_v4 = vsel %vm973_vm1, %v2557_v58, %v970_v3 }
 0x916   :  { %v987_v54 = vmul.f32 %v974_v4, %v3017_v9  ;;  %v2448_v9 = vld [vmem:[%s3420_s16 + $0x18] sm:$0xff] }
 0x917   :  { %v978_v5 = vmul.f32 0.5, %v977_v53  ;;  %1135 = vmatpush.bf16.msra.mxu0 %v2448_v9 }
 0x918   :  { %v994_v13 = vmul.f32 %v2494_v43, %v987_v54 }
 0x919   :  { %v979_v7 = vsub.f32 1.5, %v978_v5 }
 0x91a   :  { %v3053_v17 = vadd.f32 %v2495_v46, %v994_v13 }
 0x91b   :  { %v980_v8 = vmul.f32 %v2559_v0, %v979_v7 }
 0x91d   :  { %v984_v10 = vsel %vm983_vm7, %v2559_v0, %v980_v8 }
 0x91e   :  { %v988_v12 = vmul.f32 %v984_v10, %v3023_v16  ;;  %v2447_v16 = vld [vmem:[%s3420_s16 + $0x10] sm:$0xff] }
 0x91f   :  { %1136 = vmatpush.bf16.msra.mxu0 %v2447_v16 }
 0x920   :  { %v995_v15 = vmul.f32 %v2494_v43, %v988_v12  ;;  %v2497_v12 = vld [vmem:[%s3419_s17] ss:$0 sm:$0xff] }
 0x922   :  { %v3055_v18 = vadd.f32 %v2495_v46, %v995_v15 }
 0x923   :  { %1137 = vmatpush.bf16.msra.mxu0 %v2446_v20 }
 0x924   :  { %v1004_v19 = vpack.c.bf16 %v3055_v18, %v3053_v17 }
 0x926   :  { %2320 = vmatmul.msk.bf16.gmra.mxu3 %vm192_vm6, %v1004_v19 }
 0x927   :  { %1138 = vmatpush.bf16.msra.mxu0 %v2445_v23 }
 0x972   :  { %v1040_v22 = vpop.f32.mrf.mxu3 }
 0x973   :  { %v1041_v24 = vadd.f32 %v2496_v21, %v1040_v22 }
 0x975   :  { %v1050_v25 = vmul.f32 %v1041_v24, %v1041_v24 }
 0x977   :  { %v1054_v1 = vmul.f32 %v1050_v25, %v1041_v24 }
 0x979   :  { %v1058_v26 = vmul.f32 0.044715, %v1054_v1 }
 0x97a   :  { %v1042_v27 = vpop.f32.mrf.mxu3 }
 0x97b   :  { %v1062_v28 = vadd.f32 %v1058_v26, %v1041_v24  ;;  %v1043_v29 = vadd.f32 %v2496_v21, %v1042_v27 }
 0x97d   :  { %v1066_v30 = vmul.f32 0.7978846, %v1062_v28  ;;  %v1051_v32 = vmul.f32 %v1043_v29, %v1043_v29 }
 0x97f   :  { %v1055_v33 = vmul.f32 %v1051_v32, %v1043_v29  ;;  %2560 = vtanh.f32 %v1066_v30 }
 0x981   :  { %v1059_v34 = vmul.f32 0.044715, %v1055_v33 }
 0x983   :  { %v1063_v35 = vadd.f32 %v1059_v34, %v1043_v29 }
 0x985   :  { %v1067_v38 = vmul.f32 0.7978846, %v1063_v35  ;;  %v2561_v41 = vpop.eup %2560 }
 0x986   :  { %v1074_v42 = vadd.f32 1.0, %v2561_v41 }
 0x987   :  { %2562 = vtanh.f32 %v1067_v38 }
 0x988   :  { %v1078_v44 = vmul.f32 0.5, %v1074_v42 }
 0x98a   :  { %v1082_v46 = vmul.f32 %v1078_v44, %v1041_v24 }
 0x98d   :  { %v2563_v43 = vpop.eup %2562 }
 0x98e   :  { %v1075_v63 = vadd.f32 1.0, %v2563_v43 }
 0x990   :  { %v1079_v61 = vmul.f32 0.5, %v1075_v63 }
 0x992   :  { %v1083_v47 = vmul.f32 %v1079_v61, %v1043_v29 }
 0x994   :  { %v1086_v48 = vpack.c.bf16 %v1083_v47, %v1082_v46 }
 0x996   :  { %2337 = vmatmul.msk.bf16.vlgmr.msra.gmra.mxu0 %vm1124_vm9, %v1086_v48 }
 0x9a9   :  { %v1045_v49 = vpop.f32.mrf.mxu3 }
 0x9aa   :  { %v1046_v14 = vadd.f32 %v2496_v21, %v1045_v49 }
 0x9ac   :  { %v1052_v57 = vmul.f32 %v1046_v14, %v1046_v14 }
 0x9ae   :  { %v1056_v6 = vmul.f32 %v1052_v57, %v1046_v14 }
 0x9b0   :  { %v1060_v51 = vmul.f32 0.044715, %v1056_v6 }
 0x9b1   :  { %v1047_v55 = vpop.f32.mrf.mxu3 }
 0x9b2   :  { %v1064_v52 = vadd.f32 %v1060_v51, %v1046_v14  ;;  %v1048_v58 = vadd.f32 %v2496_v21, %v1047_v55  ;;  %v2449_v55 = vld [vmem:[%s3410_s8 + $0x10] sm:$0xff] }
 0x9b4   :  { %v1068_v36 = vmul.f32 0.7978846, %v1064_v52  ;;  %v1053_v59 = vmul.f32 %v1048_v58, %v1048_v58 }
 0x9b6   :  { %v1057_v60 = vmul.f32 %v1053_v59, %v1048_v58  ;;  %2564 = vtanh.f32 %v1068_v36 }
 0x9b8   :  { %v1061_v37 = vmul.f32 0.044715, %v1057_v60 }
 0x9ba   :  { %v1065_v62 = vadd.f32 %v1061_v37, %v1048_v58 }
 0x9bc   :  { %v1069_v0 = vmul.f32 0.7978846, %v1065_v62  ;;  %v2565_v3 = vpop.eup %2564 }
 0x9bd   :  { %v1076_v11 = vadd.f32 1.0, %v2565_v3 }
 0x9be   :  { %2566 = vtanh.f32 %v1069_v0 }
 0x9bf   :  { %v1080_v5 = vmul.f32 0.5, %v1076_v11 }
 0x9c1   :  { %v1084_v54 = vmul.f32 %v1080_v5, %v1046_v14  ;;  %v2450_v14 = vld [vmem:[%s3410_s8 + $0x18] sm:$0xff] }
 0x9c2   :  { %1294 = vmatpush.bf16.msra.mxu1 %v2450_v14 }
 0x9c4   :  { %v2567_v53 = vpop.eup %2566 }
 0x9c5   :  { %v1077_v4 = vadd.f32 1.0, %v2567_v53 }
 0x9c6   :  { %1295 = vmatpush.bf16.msra.mxu1 %v2449_v55 }
 0x9c7   :  { %v1081_v7 = vmul.f32 0.5, %v1077_v4 }
 0x9c9   :  { %v1085_v8 = vmul.f32 %v1081_v7, %v1048_v58 }
 0x9cb   :  { %v1087_v10 = vpack.c.bf16 %v1085_v8, %v1084_v54  ;;  %v2498_v8 = vld [vmem:[%s3421_s18] ss:$0 sm:$0xff] }
 0x9cd   :  { %2338 = vmatmul.msk.bf16.gmra.mxu0 %vm1124_vm9, %v1087_v10 }
 0xa13   :  { %v1140_v13 = vpop.f32.mrf.mxu0 }
 0xa14   :  { %v1141_v15 = vadd.f32 %v2497_v12, %v1140_v13 }
 0xa16   :  { %v1150_v19 = vadd.f32 %v1141_v15, %v3042_v50  ;;  %v2499_v15 = vld [vmem:[%s3422_s19] ss:$0 sm:$0xff] }
 0xa18   :  { %v1156_v9 = vsel %vm192_vm6, %v1150_v19, 0.0 }
 0xa19   :  { %1157 = vadd.xlane.f32.xlu1 %v1156_v9 }
 0xa1b   :  { %v1142_v16 = vpop.f32.mrf.mxu0 }
 0xa1c   :  { %v1143_v20 = vadd.f32 %v2497_v12, %v1142_v16 }
 0xa1e   :  { %v1151_v21 = vadd.f32 %v1143_v20, %v3044_v2 }
 0xa20   :  { %v1159_v22 = vsel %vm192_vm6, %v1151_v21, 0.0 }
 0xa21   :  { %1160 = vadd.xlane.f32.xlu2 %v1159_v22 }
 0xa4a   :  { %v1145_v23 = vpop.f32.mrf.mxu0 }
 0xa4b   :  { %v1146_v24 = vadd.f32 %v2497_v12, %v1145_v23 }
 0xa4d   :  { %v1152_v25 = vadd.f32 %v1146_v24, %v3053_v17 }
 0xa4f   :  { %v1162_v1 = vsel %vm192_vm6, %v1152_v25, 0.0 }
 0xa50   :  { %1163 = vadd.xlane.f32.xlu0 %v1162_v1 }
 0xa52   :  { %v1147_v26 = vpop.f32.mrf.mxu0 }
 0xa53   :  { %v1148_v27 = vadd.f32 %v2497_v12, %v1147_v26 }
 0xa55   :  { %v1153_v50 = vadd.f32 %v1148_v27, %v3055_v18 }
 0xa57   :  { %v1165_v28 = vsel %vm192_vm6, %v1153_v50, 0.0 }
 0xa58   :  { %1166 = vadd.xlane.f32.xlu1 %v1165_v28 }
 0xa8c   :  { %v1158_v29 = vpop.xlane.xlu1 %1157 }
 0xa8d   :  { %v1168_v2 = vmul.f32 %v1158_v29, %v2799_v39 }
 0xa8f   :  { %v1172_v30 = vsub.f32 %v1150_v19, %v1168_v2 }
 0xa91   :  { %v1176_v32 = vmul.f32 %v1172_v30, %v1172_v30 }
 0xa93   :  { %v1180_v33 = vsel %vm192_vm6, %v1176_v32, 0.0 }
 0xa94   :  { %1181 = vadd.xlane.f32.xlu2 %v1180_v33  ;;  %v1161_v34 = vpop.xlane.xlu2 %1160 }
 0xa95   :  { %v1169_v17 = vmul.f32 %v1161_v34, %v2799_v39 }
 0xa97   :  { %v1173_v35 = vsub.f32 %v1151_v21, %v1169_v17 }
 0xa99   :  { %v1177_v38 = vmul.f32 %v1173_v35, %v1173_v35 }
 0xa9b   :  { %v1183_v41 = vsel %vm192_vm6, %v1177_v38, 0.0 }
 0xa9c   :  { %1184 = vadd.xlane.f32.xlu0 %v1183_v41 }
 0xac3   :  { %v1164_v18 = vpop.xlane.xlu0 %1163 }
 0xac4   :  { %v1170_v42 = vmul.f32 %v1164_v18, %v2799_v39 }
 0xac6   :  { %v3093_v43 = vsub.f32 %v1152_v25, %v1170_v42 }
 0xac8   :  { %v1178_v44 = vmul.f32 %v3093_v43, %v3093_v43 }
 0xaca   :  { %v1186_v63 = vsel %vm192_vm6, %v1178_v44, 0.0 }
 0xacb   :  { %v1167_v61 = vpop.xlane.xlu1 %1166  ;;  %1187 = vadd.xlane.f32.xlu1 %v1186_v63 }
 0xacc   :  { %v1171_v46 = vmul.f32 %v1167_v61, %v2799_v39 }
 0xace   :  { %v3099_v47 = vsub.f32 %v1153_v50, %v1171_v46 }
 0xad0   :  { %v1179_v48 = vmul.f32 %v3099_v47, %v3099_v47 }
 0xad2   :  { %v1189_v49 = vsel %vm192_vm6, %v1179_v48, 0.0 }
 0xad3   :  { %1190 = vadd.xlane.f32.xlu2 %v1189_v49 }
 0xb07   :  { %v1182_v57 = vpop.xlane.xlu2 %1181 }
 0xb08   :  { %v1192_v6 = vmul.f32 %v1182_v57, %v2799_v39 }
 0xb0a   :  { %v1196_v51 = vadd.f32 1e-05, %v1192_v6 }
 0xb0c   :  { %2568 = vrsqrt.f32 %v1196_v51  ;;  %vm1206_vm11 = vweird.f32 %v1196_v51 }
 0xb0f   :  { %v1185_v52 = vpop.xlane.xlu0 %1184 }
 0xb10   :  { %v1193_v58 = vmul.f32 %v1185_v52, %v2799_v39 }
 0xb12   :  { %v2569_v36 = vpop.eup %2568  ;;  %v1197_v59 = vadd.f32 1e-05, %v1193_v58 }
 0xb13   :  { %v1201_v60 = vmul.f32 %v2569_v36, %v1196_v51  ;;  %vm1207_vm10 = vweird.f32 %v2569_v36 }
 0xb14   :  { %2570 = vrsqrt.f32 %v1197_v59  ;;  %vm1208_vm12 = vmor %vm1206_vm11, %vm1207_vm10  ;;  %vm1216_vm14 = vweird.f32 %v1197_v59 }
 0xb15   :  { %v1202_v37 = vmul.f32 %v2569_v36, %v1201_v60 }
 0xb17   :  { %v1203_v62 = vmul.f32 0.5, %v1202_v37 }
 0xb19   :  { %v1204_v0 = vsub.f32 1.5, %v1203_v62 }
 0xb1a   :  { %v2571_v3 = vpop.eup %2570 }
 0xb1b   :  { %v1205_v11 = vmul.f32 %v2569_v36, %v1204_v0  ;;  %v1211_v53 = vmul.f32 %v2571_v3, %v1197_v59  ;;  %vm1217_vm13 = vweird.f32 %v2571_v3 }
 0xb1c   :  { %vm1218_vm15 = vmor %vm1216_vm14, %vm1217_vm13 }
 0xb1d   :  { %v1212_v4 = vmul.f32 %v2571_v3, %v1211_v53  ;;  %v1209_v5 = vsel %vm1208_vm12, %v2569_v36, %v1205_v11 }
 0xb1e   :  { %v1240_v10 = vmul.f32 %v1209_v5, %v1172_v30 }
 0xb1f   :  { %v1213_v7 = vmul.f32 0.5, %v1212_v4 }
 0xb20   :  { %v1247_v19 = vmul.f32 %v2498_v8, %v1240_v10 }
 0xb21   :  { %v1214_v54 = vsub.f32 1.5, %v1213_v7 }
 0xb22   :  { %v3118_v20 = vadd.f32 %v2499_v15, %v1247_v19 }
 0xb23   :  { %v1215_v12 = vmul.f32 %v2571_v3, %v1214_v54 }
 0xb25   :  { %v1219_v13 = vsel %vm1218_vm15, %v2571_v3, %v1215_v12 }
 0xb26   :  { %v1241_v9 = vmul.f32 %v1219_v13, %v1173_v35 }
 0xb28   :  { %v1248_v16 = vmul.f32 %v2498_v8, %v1241_v9 }
 0xb2a   :  { %v3120_v21 = vadd.f32 %v2499_v15, %v1248_v16 }
 0xb2c   :  { %v1258_v22 = vpack.c.bf16 %v3120_v21, %v3118_v20 }
 0xb2e   :  { %2352 = vmatmul.msk.bf16.vlgmr.msra.gmra.mxu1 %vm192_vm6, %v1258_v22 }
 0xb3e   :  { %v1188_v23 = vpop.xlane.xlu1 %1187 }
 0xb3f   :  { %v1194_v24 = vmul.f32 %v1188_v23, %v2799_v39 }
 0xb41   :  { %v1198_v25 = vadd.f32 1e-05, %v1194_v24 }
 0xb43   :  { %2572 = vrsqrt.f32 %v1198_v25  ;;  %vm1226_vm1 = vweird.f32 %v1198_v25 }
 0xb46   :  { %v1191_v1 = vpop.xlane.xlu2 %1190 }
 0xb47   :  { %v1195_v26 = vmul.f32 %v1191_v1, %v2799_v39 }
 0xb49   :  { %v2573_v27 = vpop.eup %2572  ;;  %v1199_v50 = vadd.f32 1e-05, %v1195_v26 }
 0xb4a   :  { %v1221_v28 = vmul.f32 %v2573_v27, %v1198_v25  ;;  %vm1227_vm0 = vweird.f32 %v2573_v27 }
 0xb4b   :  { %2574 = vrsqrt.f32 %v1199_v50  ;;  %vm1228_vm2 = vmor %vm1226_vm1, %vm1227_vm0  ;;  %vm1236_vm7 = vweird.f32 %v1199_v50 }
 0xb4c   :  { %v1222_v29 = vmul.f32 %v2573_v27, %v1221_v28 }
 0xb4e   :  { %v1223_v2 = vmul.f32 0.5, %v1222_v29 }
 0xb50   :  { %v1224_v30 = vsub.f32 1.5, %v1223_v2 }
 0xb51   :  { %v2575_v32 = vpop.eup %2574 }
 0xb52   :  { %v1225_v33 = vmul.f32 %v2573_v27, %v1224_v30  ;;  %v1231_v34 = vmul.f32 %v2575_v32, %v1199_v50  ;;  %vm1237_vm3 = vweird.f32 %v2575_v32 }
 0xb53   :  { %vm1238_vm10 = vmor %vm1236_vm7, %vm1237_vm3 }
 0xb54   :  { %v1232_v17 = vmul.f32 %v2575_v32, %v1231_v34  ;;  %v1229_v35 = vsel %vm1228_vm2, %v2573_v27, %v1225_v33 }
 0xb55   :  { %v1242_v18 = vmul.f32 %v1229_v35, %v3093_v43  ;;  %v2500_v43 = vld [vmem:[%s3443_s4 + $0x1] ss:$0 sm:$0xff] }
 0xb56   :  { %v1233_v38 = vmul.f32 0.5, %v1232_v17 }
 0xb57   :  { %v1249_v61 = vmul.f32 %v2498_v8, %v1242_v18 }
 0xb58   :  { %v1234_v41 = vsub.f32 1.5, %v1233_v38 }
 0xb59   :  { %v3129_v48 = vadd.f32 %v2499_v15, %v1249_v61 }
 0xb5a   :  { %v1235_v42 = vmul.f32 %v2575_v32, %v1234_v41 }
 0xb5c   :  { %v1239_v44 = vsel %vm1238_vm10, %v2575_v32, %v1235_v42 }
 0xb5d   :  { %v1243_v63 = vmul.f32 %v1239_v44, %v3099_v47 }
 0xb5f   :  { %v1250_v46 = vmul.f32 %v2498_v8, %v1243_v63 }
 0xb61   :  { %v3131_v49 = vadd.f32 %v2499_v15, %v1250_v46 }
 0xb63   :  { %v1259_v14 = vpack.c.bf16 %v3131_v49, %v3129_v48 }
 0xb65   :  { %2353 = vmatmul.msk.bf16.gmra.mxu1 %vm192_vm6, %v1259_v14 }
 0xbab   :  { %v1297_v57 = vpop.f32.mrf.mxu1 }
 0xbac   :  { %v1298_v6 = vadd.f32 %v2500_v43, %v1297_v57 }
 0xbae   :  { %v1307_v51 = vpack.c.bf16 %v1298_v6, %v1298_v6 }
 0xbb0   :  { %v1312_v55 = vunpack.c.l.b16 %v1307_v51 }
 0xbb2   :  { %v3139_v47 = vpack.c.b16 %v1312_v55, %v1312_v55 }
 0xbb3   :  { %v1299_v52 = vpop.f32.mrf.mxu1 }
 0xbb4   :  { %v1300_v58 = vadd.f32 %v2500_v43, %v1299_v52  ;;  %1314 = vrot.lane.b32.xlu0 %v3139_v47, %s2635_s27 }
 0xbb6   :  { %v1308_v36 = vpack.c.bf16 %v1300_v58, %v1300_v58 }
 0xbb8   :  { %v1336_v59 = vunpack.c.l.b16 %v1308_v36 }
 0xbba   :  { %v3143_v60 = vpack.c.b16 %v1336_v59, %v1336_v59 }
 0xbbc   :  { %1338 = vrot.lane.b32.xlu1 %v3143_v60, %s2635_s27 }
 0xbc4   :  { %1541 = vrot.lane.b32.xlu1 %v3139_v47, %s2637_s3 }
 0xbe2   :  { %v1302_v37 = vpop.f32.mrf.mxu1 }
 0xbe3   :  { %v1303_v62 = vadd.f32 %v2500_v43, %v1302_v37 }
 0xbe5   :  { %v1309_v0 = vpack.c.bf16 %v1303_v62, %v1303_v62 }
 0xbe7   :  { %v1360_v3 = vunpack.c.l.b16 %v1309_v0 }
 0xbe9   :  { %v3149_v11 = vpack.c.b16 %v1360_v3, %v1360_v3 }
 0xbea   :  { %v1304_v53 = vpop.f32.mrf.mxu1 }
 0xbeb   :  { %v1305_v4 = vadd.f32 %v2500_v43, %v1304_v53  ;;  %1362 = vrot.lane.b32.xlu2 %v3149_v11, %s2635_s27 }
 0xbed   :  { %v1310_v5 = vpack.c.bf16 %v1305_v4, %v1305_v4 }
 0xbef   :  { %v1384_v7 = vunpack.c.l.b16 %v1310_v5 }
 0xbf1   :  { %v3153_v54 = vpack.c.b16 %v1384_v7, %v1384_v7 }
 0xbf3   :  { %1386 = vrot.lane.b32.xlu0 %v3153_v54, %s2635_s27 }
 0xbfb   :  { %1455 = vrot.lane.b32.xlu0 %v3139_v47, %s2636_s5 }
 0xc26   :  { %v1315_v8 = vpop.permute.xlu0 %1314 }
 0xc27   :  { %v1320_v10 = vsel %vm378_vm4, %v1315_v8, 0 }
 0xc28   :  { %1329 = vmatpush.bf16.xpose.msra.mxu2 %v1320_v10 }
 0xc2e   :  { %v1339_v12 = vpop.permute.xlu1 %1338 }
 0xc2f   :  { %v1344_v13 = vsel %vm378_vm4, %v1339_v12, 0  ;;  %2354 = vmatmul.msk.bf16.vlgmr.msra.gmra.mxu2 %vm378_vm4, %v1307_v51 }
 0xc30   :  { %1353 = vmatpush.bf16.xpose.msra.mxu3 %v1344_v13 }
 0xc36   :  { %v1542_v22 = vpop.permute.xlu1 %1541 }
 0xc37   :  { %2355 = vmatmul.msk.bf16.vlgmr.msra.gmra.mxu3 %vm378_vm4, %v1308_v36  ;;  %v1547_v25 = vsel %vm378_vm4, %v1542_v22, 0 }
 0xc45   :  { %v1363_v15 = vpop.permute.xlu2 %1362 }
 0xc46   :  { %v1368_v19 = vsel %vm378_vm4, %v1363_v15, 0 }
 0xc47   :  { %1377 = vmatpush.bf16.xpose.msrb.mxu0 %v1368_v19 }
 0xc4e   :  { %2356 = vmatmul.msk.bf16.vlgmr.msrb.gmra.mxu0 %vm378_vm4, %v1309_v0 }
 0xc65   :  { %v1387_v9 = vpop.permute.xlu0 %1386 }
 0xc66   :  { %v1392_v16 = vsel %vm378_vm4, %v1387_v9, 0 }
 0xc67   :  { %1401 = vmatpush.bf16.xpose.msrb.mxu1 %v1392_v16 }
 0xc6d   :  { %v1456_v23 = vpop.permute.xlu0 %1455 }
 0xc6e   :  { %v1461_v24 = vsel %vm524_vm5, %v1456_v23, 0  ;;  %2357 = vmatmul.msk.bf16.vlgmr.msrb.gmra.mxu1 %vm378_vm4, %v1310_v5 }
 0xc6f   :  { %1470 = vmatpush.bf16.msrb.mxu2 %v1461_v24 }
 0xc73   :  { %1556 = vmatpush.bf16.xpose.msra.mxu2 %v1547_v25 }
 0xcb2   :  { %v1331_v1 = vpop.f32.mrf.mxu2 }
 0xcb3   :  { %v1332_v26 = vadd.f32 %v1331_v1, %v2893_v31 }
 0xcb5   :  { %v1407_v27 = vsel %vm470_vm8, %v1332_v26, -inf }
 0xcb6   :  { %1408 = vmax.xlane.f32.xlu0 %v1407_v27 }
 0xcba   :  { %v1333_v50 = vpop.f32.mrf.mxu2  ;;  %v1355_v28 = vpop.f32.mrf.mxu3 }
 0xcbb   :  { %v1356_v29 = vadd.f32 %v1355_v28, %v2899_v40 }
 0xcbd   :  { %v1410_v2 = vsel %vm470_vm8, %v1356_v29, -inf }
 0xcbe   :  { %1411 = vmax.xlane.f32.xlu2 %v1410_v2 }
 0xcc2   :  { %v1357_v30 = vpop.f32.mrf.mxu3 }
 0xccb   :  { %v1379_v32 = vpop.f32.mrf.mxu0 }
 0xccc   :  { %v1380_v33 = vadd.f32 %v1379_v32, %v2903_v45 }
 0xcce   :  { %v1413_v34 = vsel %vm470_vm8, %v1380_v33, -inf }
 0xccf   :  { %1414 = vmax.xlane.f32.xlu1 %v1413_v34 }
 0xcd3   :  { %v1381_v17 = vpop.f32.mrf.mxu0 }
 0xcd6   :  { %1476 = vrot.lane.b32.xlu2 %v3143_v60, %s2636_s5 }
 0xce8   :  { %1539 = vrot.lane.b32.xlu1 %v3139_v47, %s2638_s2 }
 0xceb   :  { %v1403_v35 = vpop.f32.mrf.mxu1 }
 0xcec   :  { %v1404_v38 = vadd.f32 %v1403_v35, %v2911_v56 }
 0xcee   :  { %v1416_v41 = vsel %vm470_vm8, %v1404_v38, -inf }
 0xcef   :  { %1417 = vmax.xlane.f32.xlu0 %v1416_v41 }
 0xcf0   :  { %1562 = vrot.lane.b32.xlu1 %v3143_v60, %s2638_s2 }
 0xcf3   :  { %v1405_v18 = vpop.f32.mrf.mxu1 }
 0xcf8   :  { %1497 = vrot.lane.b32.xlu1 %v3149_v11, %s2636_s5 }
 0xd03   :  { %1564 = vrot.lane.b32.xlu0 %v3143_v60, %s2637_s3 }
 0xd29   :  { %v1409_v42 = vpop.xlane.xlu0 %1408 }
 0xd2a   :  { %v1419_v44 = vsub.f32 %v1332_v26, %v1409_v42 }
 0xd2c   :  { %v1423_v63 = vmul.f32 1.442695, %v1419_v44 }
 0xd2e   :  { %2576 = vpow2.f32 %v1423_v63 }
 0xd31   :  { %v1412_v61 = vpop.xlane.xlu2 %1411 }
 0xd32   :  { %v1420_v46 = vsub.f32 %v1356_v29, %v1412_v61 }
 0xd34   :  { %v2577_v14 = vpop.eup %2576  ;;  %v1425_v43 = vmul.f32 1.442695, %v1420_v46 }
 0xd35   :  { %v1431_v57 = vsel %vm470_vm8, %v2577_v14, 0.0 }
 0xd36   :  { %2578 = vpow2.f32 %v1425_v43  ;;  %1432 = vadd.xlane.f32.xlu2 %v1431_v57 }
 0xd39   :  { %v1477_v6 = vpop.permute.xlu2 %1476 }
 0xd3a   :  { %v1482_v51 = vsel %vm524_vm5, %v1477_v6, 0 }
 0xd3b   :  { %1491 = vmatpush.bf16.msrb.mxu3 %v1482_v51 }
 0xd3c   :  { %v2579_v55 = vpop.eup %2578 }
 0xd3d   :  { %v1434_v52 = vsel %vm470_vm8, %v2579_v55, 0.0 }
 0xd3e   :  { %1435 = vadd.xlane.f32.xlu1 %v1434_v52 }
 0xd42   :  { %v1415_v58 = vpop.xlane.xlu1 %1414 }
 0xd43   :  { %v1421_v36 = vsub.f32 %v1380_v33, %v1415_v58 }
 0xd45   :  { %v1427_v59 = vmul.f32 1.442695, %v1421_v36 }
 0xd47   :  { %2580 = vpow2.f32 %v1427_v59 }
 0xd4d   :  { %v2581_v37 = vpop.eup %2580 }
 0xd4e   :  { %v1437_v62 = vsel %vm470_vm8, %v2581_v37, 0.0 }
 0xd4f   :  { %1438 = vadd.xlane.f32.xlu2 %v1437_v62 }
 0xd57   :  { %1518 = vrot.lane.b32.xlu1 %v3153_v54, %s2636_s5 }
 0xd5a   :  { %v1540_v0 = vpop.permute.xlu1 %1539 }
 0xd5f   :  { %1587 = vrot.lane.b32.xlu1 %v3149_v11, %s2637_s3 }
 0xd62   :  { %v1563_v3 = vpop.permute.xlu1 %1562  ;;  %v1418_v53 = vpop.xlane.xlu0 %1417 }
 0xd63   :  { %v1422_v4 = vsub.f32 %v1404_v38, %v1418_v53 }
 0xd65   :  { %v1429_v5 = vmul.f32 1.442695, %v1422_v4 }
 0xd67   :  { %2582 = vpow2.f32 %v1429_v5  ;;  %1585 = vrot.lane.b32.xlu1 %v3149_v11, %s2638_s2  ;;  %1610 = vrot.lane.b32.xlu2 %v3153_v54, %s2637_s3 }
 0xd6a   :  { %v1498_v7 = vpop.permute.xlu1 %1497 }
 0xd6b   :  { %v1503_v8 = vsel %vm524_vm5, %v1498_v7, 0 }
 0xd6c   :  { %1512 = vmatpush.bf16.msra.mxu0 %v1503_v8 }
 0xd6d   :  { %v2583_v10 = vpop.eup %2582 }
 0xd6e   :  { %v1440_v12 = vsel %vm470_vm8, %v2583_v10, 0.0 }
 0xd6f   :  { %1441 = vadd.xlane.f32.xlu0 %v1440_v12 }
 0xd75   :  { %v1565_v13 = vpop.permute.xlu0 %1564 }
 0xd76   :  { %v1570_v15 = vsel %vm378_vm4, %v1565_v13, 0 }
 0xd77   :  { %1579 = vmatpush.bf16.xpose.msra.mxu3 %v1570_v15 }
 0xd83   :  { %1608 = vrot.lane.b32.xlu0 %v3153_v54, %s2638_s2 }
 0xda9   :  { %v1433_v19 = vpop.xlane.xlu2 %1432 }
 0xdaa   :  { %2584 = vrcp.f32 %v1433_v19 }
 0xdb0   :  { %v2585_v9 = vpop.eup %2584 }
 0xdb1   :  { %v1447_v16 = vmul.f32 %v2585_v9, %v2577_v14  ;;  %v1436_v22 = vpop.xlane.xlu1 %1435 }
 0xdb2   :  { %2586 = vrcp.f32 %v1436_v22 }
 0xdb3   :  { %v1451_v23 = vpack.c.bf16 %v1447_v16, %v1447_v16 }
 0xdb5   :  { %2358 = vmatmul.msk.bf16.vlgmr.msrb.gmra.mxu2 %vm470_vm8, %v1451_v23 }
 0xdb8   :  { %v2587_v24 = vpop.eup %2586 }
 0xdb9   :  { %v1448_v25 = vmul.f32 %v2587_v24, %v2579_v55 }
 0xdbb   :  { %v1452_v1 = vpack.c.bf16 %v1448_v25, %v1448_v25 }
 0xdbd   :  { %2359 = vmatmul.msk.bf16.vlgmr.msrb.gmra.mxu3 %vm470_vm8, %v1452_v1 }
 0xdc2   :  { %v1439_v26 = vpop.xlane.xlu2 %1438 }
 0xdc3   :  { %2588 = vrcp.f32 %v1439_v26 }
 0xdc5   :  { %2362 = vmatmul.msk.bf16.vlgmr.msra.gmra.mxu2 %vm378_vm4, %v1540_v0 }
 0xdc9   :  { %v2589_v27 = vpop.eup %2588  ;;  %v1519_v50 = vpop.permute.xlu1 %1518 }
 0xdca   :  { %v1449_v28 = vmul.f32 %v2589_v27, %v2581_v37  ;;  %v1524_v29 = vsel %vm524_vm5, %v1519_v50, 0  ;;  %v1611_v2 = vpop.permute.xlu2 %1610 }
 0xdcb   :  { %v1616_v30 = vsel %vm378_vm4, %v1611_v2, 0  ;;  %1533 = vmatpush.bf16.msra.mxu1 %v1524_v29 }
 0xdcc   :  { %v1453_v32 = vpack.c.bf16 %v1449_v28, %v1449_v28 }
 0xdcd   :  { %2363 = vmatmul.msk.bf16.vlgmr.msra.gmra.mxu3 %vm378_vm4, %v1563_v3 }
 0xdce   :  { %2360 = vmatmul.msk.bf16.vlgmr.msra.gmra.mxu0 %vm470_vm8, %v1453_v32 }
 0xdcf   :  { %1625 = vmatpush.bf16.xpose.msrb.mxu1 %v1616_v30 }
 0xdd1   :  { %v1588_v33 = vpop.permute.xlu1 %1587 }
 0xdd2   :  { %v1593_v34 = vsel %vm378_vm4, %v1588_v33, 0 }
 0xdd3   :  { %1602 = vmatpush.bf16.xpose.msrb.mxu0 %v1593_v34 }
 0xdd9   :  { %v1586_v17 = vpop.permute.xlu1 %1585 }
 0xdde   :  { %2364 = vmatmul.msk.bf16.vlgmr.msrb.gmra.mxu0 %vm378_vm4, %v1586_v17 }
 0xde2   :  { %v1442_v35 = vpop.xlane.xlu0 %1441 }
 0xde3   :  { %2590 = vrcp.f32 %v1442_v35 }
 0xde9   :  { %v2591_v38 = vpop.eup %2590 }
 0xdea   :  { %v1450_v41 = vmul.f32 %v2591_v38, %v2583_v10 }
 0xdec   :  { %v1454_v18 = vpack.c.bf16 %v1450_v41, %v1450_v41 }
 0xdee   :  { %2361 = vmatmul.msk.bf16.vlgmr.msra.gmra.mxu1 %vm470_vm8, %v1454_v18 }
 0xdf5   :  { %v1609_v42 = vpop.permute.xlu0 %1608 }
 0xdfe   :  { %2365 = vmatmul.msk.bf16.vlgmr.msrb.gmra.mxu1 %vm378_vm4, %v1609_v42 }
 0xe38   :  { %v3215_v44 = vpop.f32.mrf.mxu2 }
 0xe40   :  { %v1474_v63 = vpop.f32.mrf.mxu2  ;;  %v3217_v61 = vpop.f32.mrf.mxu3 }
 0xe48   :  { %v1495_v46 = vpop.f32.mrf.mxu3  ;;  %v1558_v14 = vpop.f32.mrf.mxu2 }
 0xe49   :  { %v1559_v43 = vadd.f32 %v1558_v14, %v2893_v31 }
 0xe4b   :  { %v3220_v57 = vpop.f32.mrf.mxu0  ;;  %v1631_v6 = vsel %vm470_vm8, %v1559_v43, -inf }
 0xe4c   :  { %1632 = vmax.xlane.f32.xlu1 %v1631_v6 }
 0xe50   :  { %v1560_v51 = vpop.f32.mrf.mxu2  ;;  %v1581_v55 = vpop.f32.mrf.mxu3 }
 0xe51   :  { %v1582_v52 = vadd.f32 %v1581_v55, %v2899_v40 }
 0xe53   :  { %v1516_v58 = vpop.f32.mrf.mxu0  ;;  %v1634_v36 = vsel %vm470_vm8, %v1582_v52, -inf }
 0xe54   :  { %1635 = vmax.xlane.f32.xlu0 %v1634_v36 }
 0xe58   :  { %v1583_v59 = vpop.f32.mrf.mxu3 }
 0xe5b   :  { %v1604_v37 = vpop.f32.mrf.mxu0 }
 0xe5c   :  { %v1605_v62 = vadd.f32 %v1604_v37, %v2903_v45 }
 0xe5e   :  { %v1637_v0 = vsel %vm470_vm8, %v1605_v62, -inf }
 0xe5f   :  { %1638 = vmax.xlane.f32.xlu2 %v1637_v0  ;;  %v2452_v0 = vld [vmem:[%s3413_s10 + $0x18] sm:$0xff] }
 0xe63   :  { %v1606_v31 = vpop.f32.mrf.mxu0 }
 0xe6b   :  { %v3227_v3 = vpop.f32.mrf.mxu1 }
 0xe73   :  { %v1537_v53 = vpop.f32.mrf.mxu1 }
 0xe77   :  { %1679 = vrot.lane.b32.xlu2 %v3139_v47, %s2639_s23 }
 0xe7b   :  { %v1627_v4 = vpop.f32.mrf.mxu1 }
 0xe7c   :  { %v1628_v40 = vadd.f32 %v1627_v4, %v2911_v56 }
 0xe7e   :  { %v1640_v5 = vsel %vm470_vm8, %v1628_v40, -inf }
 0xe7f   :  { %1742 = vrot.lane.b32.xlu2 %v3153_v54, %s2639_s23  ;;  %1641 = vmax.xlane.f32.xlu1 %v1640_v5 }
 0xe83   :  { %v1629_v45 = vpop.f32.mrf.mxu1 }
 0xebf   :  { %v1633_v7 = vpop.xlane.xlu1 %1632 }
 0xec0   :  { %v1643_v8 = vsub.f32 %v1559_v43, %v1633_v7  ;;  %v2451_v7 = vld [vmem:[%s3413_s10 + $0x10] sm:$0xff] }
 0xec2   :  { %v1647_v10 = vmul.f32 1.442695, %v1643_v8 }
 0xec4   :  { %2592 = vpow2.f32 %v1647_v10 }
 0xec7   :  { %v1636_v15 = vpop.xlane.xlu0 %1635 }
 0xec8   :  { %v1644_v9 = vsub.f32 %v1582_v52, %v1636_v15 }
 0xeca   :  { %v2593_v12 = vpop.eup %2592  ;;  %v1649_v16 = vmul.f32 1.442695, %v1644_v9 }
 0xecb   :  { %v1655_v13 = vsel %vm470_vm8, %v2593_v12, 0.0 }
 0xecc   :  { %1656 = vadd.xlane.f32.xlu1 %v1655_v13 }
 0xed2   :  { %v1639_v47 = vpop.xlane.xlu2 %1638 }
 0xed3   :  { %v1645_v19 = vsub.f32 %v1605_v62, %v1639_v47 }
 0xed5   :  { %v1651_v56 = vmul.f32 1.442695, %v1645_v19 }
 0xed7   :  { %2594 = vpow2.f32 %v1651_v56 }
 0xed8   :  { %2596 = vpow2.f32 %v1649_v16 }
 0xeda   :  { %v1680_v22 = vpop.permute.xlu2 %1679 }
 0xedb   :  { %v1685_v54 = vsel %vm524_vm5, %v1680_v22, 0 }
 0xedc   :  { %1694 = vmatpush.bf16.msrb.mxu2 %v1685_v54 }
 0xedd   :  { %v2595_v23 = vpop.eup %2594 }
 0xede   :  { %v1661_v24 = vsel %vm470_vm8, %v2595_v23, 0.0  ;;  %v2597_v1 = vpop.eup %2596 }
 0xedf   :  { %1662 = vadd.xlane.f32.xlu0 %v1661_v24  ;;  %v1658_v27 = vsel %vm470_vm8, %v2597_v1, 0.0 }
 0xee0   :  { %1819 = vmatpush.bf16.msra.mxu2 %v2452_v0 }
 0xee2   :  { %v1743_v25 = vpop.permute.xlu2 %1742 }
 0xee3   :  { %v1748_v26 = vsel %vm524_vm5, %v1743_v25, 0 }
 0xee4   :  { %1757 = vmatpush.bf16.msra.mxu1 %v1748_v26  ;;  %1820 = vmatpush.bf16.msra.mxu2 %v2451_v7 }
 0xee5   :  { %1700 = vrot.lane.b32.xlu1 %v3143_v60, %s2639_s23 }
 0xee7   :  { %1659 = vadd.xlane.f32.xlu0 %v1658_v27 }
 0xef2   :  { %v1642_v50 = vpop.xlane.xlu1 %1641 }
 0xef3   :  { %v1646_v28 = vsub.f32 %v1628_v40, %v1642_v50 }
 0xef5   :  { %v1653_v29 = vmul.f32 1.442695, %v1646_v28 }
 0xef7   :  { %2598 = vpow2.f32 %v1653_v29 }
 0xefd   :  { %v2599_v2 = vpop.eup %2598 }
 0xefe   :  { %v1664_v30 = vsel %vm470_vm8, %v2599_v2, 0.0 }
 0xeff   :  { %1665 = vadd.xlane.f32.xlu0 %v1664_v30 }
 0xf13   :  { %1721 = vrot.lane.b32.xlu0 %v3149_v11, %s2639_s23 }
 0xf3f   :  { %v1657_v32 = vpop.xlane.xlu1 %1656 }
 0xf40   :  { %2600 = vrcp.f32 %v1657_v32 }
 0xf46   :  { %v2601_v33 = vpop.eup %2600 }
 0xf47   :  { %v1671_v34 = vmul.f32 %v2601_v33, %v2593_v12 }
 0xf49   :  { %v1675_v17 = vpack.c.bf16 %v1671_v34, %v1671_v34 }
 0xf4b   :  { %2366 = vmatmul.msk.bf16.vlgmr.msrb.gmra.mxu2 %vm470_vm8, %v1675_v17 }
 0xf52   :  { %v1663_v60 = vpop.xlane.xlu0 %1662 }
 0xf57   :  { %v1701_v35 = vpop.permute.xlu1 %1700 }
 0xf58   :  { %v1706_v38 = vsel %vm524_vm5, %v1701_v35, 0 }
 0xf59   :  { %1715 = vmatpush.bf16.msrb.mxu3 %v1706_v38 }
 0xf5a   :  { %v1660_v41 = vpop.xlane.xlu0 %1659 }
 0xf5b   :  { %2602 = vrcp.f32 %v1660_v41 }
 0xf61   :  { %v2603_v18 = vpop.eup %2602 }
 0xf62   :  { %v1672_v42 = vmul.f32 %v2603_v18, %v2597_v1 }
 0xf64   :  { %v1676_v63 = vpack.c.bf16 %v1672_v42, %v1672_v42 }
 0xf66   :  { %2367 = vmatmul.msk.bf16.vlgmr.msrb.gmra.mxu3 %vm470_vm8, %v1676_v63 }
 0xf72   :  { %v1666_v11 = vpop.xlane.xlu0 %1665 }
 0xf73   :  { %2604 = vrcp.f32 %v1666_v11 }
 0xf74   :  { %2606 = vrcp.f32 %v1663_v60 }
 0xf79   :  { %v2605_v46 = vpop.eup %2604 }
 0xf7a   :  { %v1674_v14 = vmul.f32 %v2605_v46, %v2599_v2  ;;  %v2607_v6 = vpop.eup %2606 }
 0xf7b   :  { %v1673_v51 = vmul.f32 %v2607_v6, %v2595_v23 }
 0xf7c   :  { %v1678_v43 = vpack.c.bf16 %v1674_v14, %v1674_v14 }
 0xf7d   :  { %v1677_v58 = vpack.c.bf16 %v1673_v51, %v1673_v51 }
 0xf7e   :  { %2369 = vmatmul.msk.bf16.vlgmr.msra.gmra.mxu1 %vm470_vm8, %v1678_v43 }
 0xf85   :  { %v1722_v55 = vpop.permute.xlu0 %1721 }
 0xf86   :  { %v1727_v52 = vsel %vm524_vm5, %v1722_v55, 0 }
 0xf87   :  { %1736 = vmatpush.bf16.msra.mxu0 %v1727_v52  ;;  %v2454_v52 = vld [vmem:[%s3418_s14 + $0x18] sm:$0xff] }
 0xf88   :  { %1978 = vmatpush.bf16.msra.mxu3 %v2454_v52  ;;  %v2455_v52 = vld [vmem:[%s3420_s16 + $0x20] sm:$0xff] }
 0xf8a   :  { %2368 = vmatmul.msk.bf16.vlgmr.msra.gmra.mxu0 %vm470_vm8, %v1677_v58 }
 0xfce   :  { %v1696_v36 = vpop.f32.mrf.mxu2 }
 0xfd6   :  { %v1698_v59 = vpop.f32.mrf.mxu2 }
 0xfe9   :  { %v1717_v37 = vpop.f32.mrf.mxu3 }
 0xfea   :  { %v2480_v62 = vpack.i.bf16 %v1717_v37, %v1696_v36  ;;  %v2453_v37 = vld [vmem:[%s3418_s14 + $0x10] sm:$0xff] }
 0xfeb   :  { %1979 = vmatpush.bf16.msra.mxu3 %v2453_v37 }
 0xfec   :  { %2481 = vrot.lane.b32.xlu1 %v2480_v62, %s2640_s1 }
 0xff1   :  { %v1719_v31 = vpop.f32.mrf.mxu3 }
 0xffb   :  { %v1759_v53 = vpop.f32.mrf.mxu1 }
0x1003   :  { %v1761_v4 = vpop.f32.mrf.mxu1 }
0x1007   :  { %v1738_v40 = vpop.f32.mrf.mxu0 }
0x1008   :  { %v2485_v5 = vpack.i.bf16 %v1759_v53, %v1738_v40 }
0x100a   :  { %2486 = vrot.lane.b32.xlu2 %v2485_v5, %s2640_s1 }
0x100f   :  { %v1740_v45 = vpop.f32.mrf.mxu0 }
0x105e   :  { %v2482_v8 = vpop.permute.xlu1 %2481 }
0x105f   :  { %v2484_v10 = vunpack.i.h.bf16 %v2482_v8  ;;  %v2483_v12 = vunpack.i.l.bf16 %v2482_v8 }
0x1061   :  { %v1780_v13 = vsel %vm378_vm4, %v3217_v61, %v2484_v10  ;;  %v1779_v15 = vsel %vm378_vm4, %v3215_v44, %v2483_v12  ;;  %v2501_v61 = vld [vmem:[%s3414_s11 + $0x1] ss:$0 sm:$0xff] }
0x1062   :  { %v1783_v47 = vpack.c.bf16 %v1780_v13, %v1779_v15 }
0x1064   :  { %2383 = vmatmul.msk.bf16.vlgmr.msra.gmra.mxu2 %vm192_vm6, %v1783_v47  ;;  %v2487_v19 = vpop.permute.xlu2 %2486 }
0x1065   :  { %v2489_v9 = vunpack.i.h.bf16 %v2487_v19  ;;  %v2488_v56 = vunpack.i.l.bf16 %v2487_v19 }
0x1067   :  { %v1782_v16 = vsel %vm378_vm4, %v3227_v3, %v2489_v9  ;;  %v1781_v22 = vsel %vm378_vm4, %v3220_v57, %v2488_v56 }
0x1068   :  { %v1784_v54 = vpack.c.bf16 %v1782_v16, %v1781_v22 }
0x1074   :  { %2384 = vmatmul.msk.bf16.gmra.mxu2 %vm192_vm6, %v1784_v54 }
0x10e7   :  { %v1822_v44 = vpop.f32.mrf.mxu2 }
0x10e8   :  { %v1823_v23 = vadd.f32 %v2501_v61, %v1822_v44 }
0x10ea   :  { %v1832_v24 = vadd.f32 %v1823_v23, %v3118_v20 }
0x10ec   :  { %v1840_v25 = vsel %vm192_vm6, %v1832_v24, 0.0 }
0x10ed   :  { %1841 = vadd.xlane.f32.xlu1 %v1840_v25 }
0x10ef   :  { %v1824_v1 = vpop.f32.mrf.mxu2 }
0x10f0   :  { %v1825_v26 = vadd.f32 %v2501_v61, %v1824_v1 }
0x10f2   :  { %v1833_v3 = vadd.f32 %v1825_v26, %v3120_v21 }
0x10f4   :  { %v1843_v57 = vsel %vm192_vm6, %v1833_v3, 0.0 }
0x10f5   :  { %1844 = vadd.xlane.f32.xlu2 %v1843_v57 }
0x10f7   :  { %v1827_v27 = vpop.f32.mrf.mxu2 }
0x10f8   :  { %v1828_v50 = vadd.f32 %v2501_v61, %v1827_v27 }
0x10fa   :  { %v1834_v28 = vadd.f32 %v1828_v50, %v3129_v48 }
0x10fc   :  { %v1846_v29 = vsel %vm192_vm6, %v1834_v28, 0.0 }
0x10fd   :  { %1847 = vadd.xlane.f32.xlu0 %v1846_v29 }
0x10ff   :  { %v1829_v2 = vpop.f32.mrf.mxu2 }
0x1100   :  { %v1830_v30 = vadd.f32 %v2501_v61, %v1829_v2  ;;  %v2502_v61 = vld [vmem:[%s3415_s12 + $0x1] ss:$0 sm:$0xff] }
0x1102   :  { %v1835_v20 = vadd.f32 %v1830_v30, %v3131_v49 }
0x1104   :  { %v1849_v32 = vsel %vm192_vm6, %v1835_v20, 0.0 }
0x1105   :  { %1850 = vadd.xlane.f32.xlu1 %v1849_v32 }
0x1160   :  { %v1842_v33 = vpop.xlane.xlu1 %1841 }
0x1161   :  { %v1852_v21 = vmul.f32 %v1842_v33, %v2799_v39 }
0x1163   :  { %v1856_v34 = vsub.f32 %v1832_v24, %v1852_v21 }
0x1165   :  { %v1860_v17 = vmul.f32 %v1856_v34, %v1856_v34 }
0x1167   :  { %v1864_v60 = vsel %vm192_vm6, %v1860_v17, 0.0 }
0x1168   :  { %1865 = vadd.xlane.f32.xlu2 %v1864_v60  ;;  %v1845_v35 = vpop.xlane.xlu2 %1844 }
0x1169   :  { %v1853_v48 = vmul.f32 %v1845_v35, %v2799_v39 }
0x116b   :  { %v3283_v38 = vsub.f32 %v1833_v3, %v1853_v48  ;;  %v2503_v3 = vld [vmem:[%s3416_s13 + $0x1] ss:$0 sm:$0xff] }
0x116d   :  { %v1861_v41 = vmul.f32 %v3283_v38, %v3283_v38 }
0x116f   :  { %v1867_v49 = vsel %vm192_vm6, %v1861_v41, 0.0 }
0x1170   :  { %1868 = vadd.xlane.f32.xlu0 %v1867_v49  ;;  %v1848_v18 = vpop.xlane.xlu0 %1847 }
0x1171   :  { %v1854_v42 = vmul.f32 %v1848_v18, %v2799_v39 }
0x1173   :  { %v3289_v63 = vsub.f32 %v1834_v28, %v1854_v42 }
0x1175   :  { %v1862_v11 = vmul.f32 %v3289_v63, %v3289_v63 }
0x1177   :  { %v1870_v46 = vsel %vm192_vm6, %v1862_v11, 0.0 }
0x1178   :  { %v1851_v14 = vpop.xlane.xlu1 %1850  ;;  %1871 = vadd.xlane.f32.xlu1 %v1870_v46 }
0x1179   :  { %v1855_v43 = vmul.f32 %v1851_v14, %v2799_v39 }
0x117b   :  { %v3295_v6 = vsub.f32 %v1835_v20, %v1855_v43  ;;  %v2457_v43 = vld [vmem:[%s3420_s16 + $0x30] sm:$0xff] }
0x117d   :  { %v1863_v51 = vmul.f32 %v3295_v6, %v3295_v6 }
0x117f   :  { %v1873_v55 = vsel %vm192_vm6, %v1863_v51, 0.0  ;;  %v2504_v51 = vld [vmem:[%s3417_s15 + $0x1] ss:$0 sm:$0xff] }
0x1180   :  { %1874 = vadd.xlane.f32.xlu2 %v1873_v55 }
0x11db   :  { %v1866_v58 = vpop.xlane.xlu2 %1865 }
0x11dc   :  { %v1876_v36 = vmul.f32 %v1866_v58, %v2799_v39 }
0x11de   :  { %v1880_v59 = vadd.f32 1e-05, %v1876_v36 }
0x11e0   :  { %2608 = vrsqrt.f32 %v1880_v59  ;;  %vm1890_vm5 = vweird.f32 %v1880_v59 }
0x11e3   :  { %v1869_v62 = vpop.xlane.xlu0 %1868 }
0x11e4   :  { %v1877_v0 = vmul.f32 %v1869_v62, %v2799_v39 }
0x11e6   :  { %v2609_v31 = vpop.eup %2608  ;;  %v1881_v53 = vadd.f32 1e-05, %v1877_v0 }
0x11e7   :  { %v1885_v4 = vmul.f32 %v2609_v31, %v1880_v59  ;;  %vm1891_vm4 = vweird.f32 %v2609_v31 }
0x11e8   :  { %2610 = vrsqrt.f32 %v1881_v53  ;;  %vm1892_vm8 = vmor %vm1890_vm5, %vm1891_vm4  ;;  %vm1900_vm12 = vweird.f32 %v1881_v53 }
0x11e9   :  { %v1886_v40 = vmul.f32 %v2609_v31, %v1885_v4 }
0x11eb   :  { %v1887_v5 = vmul.f32 0.5, %v1886_v40  ;;  %v1872_v45 = vpop.xlane.xlu1 %1871 }
0x11ec   :  { %v1878_v7 = vmul.f32 %v1872_v45, %v2799_v39 }
0x11ed   :  { %v1888_v8 = vsub.f32 1.5, %v1887_v5 }
0x11ee   :  { %v2611_v10 = vpop.eup %2610  ;;  %v1882_v12 = vadd.f32 1e-05, %v1878_v7 }
0x11ef   :  { %v1889_v13 = vmul.f32 %v2609_v31, %v1888_v8  ;;  %v1895_v15 = vmul.f32 %v2611_v10, %v1881_v53  ;;  %vm1901_vm11 = vweird.f32 %v2611_v10 }
0x11f0   :  { %2612 = vrsqrt.f32 %v1882_v12  ;;  %vm1902_vm13 = vmor %vm1900_vm12, %vm1901_vm11  ;;  %vm1910_vm15 = vweird.f32 %v1882_v12 }
0x11f1   :  { %v1896_v47 = vmul.f32 %v2611_v10, %v1895_v15  ;;  %v1893_v19 = vsel %vm1892_vm8, %v2609_v31, %v1889_v13 }
0x11f2   :  { %v1924_v44 = vmul.f32 %v1893_v19, %v1856_v34 }
0x11f3   :  { %v1897_v9 = vmul.f32 0.5, %v1896_v47  ;;  %v1875_v56 = vpop.xlane.xlu2 %1874 }
0x11f4   :  { %v1879_v16 = vmul.f32 %v1875_v56, %v2799_v39  ;;  %v1931_v57 = vmul.f32 %v2502_v61, %v1924_v44 }
0x11f5   :  { %v1898_v22 = vsub.f32 1.5, %v1897_v9 }
0x11f6   :  { %v2613_v54 = vpop.eup %2612  ;;  %v1883_v23 = vadd.f32 1e-05, %v1879_v16  ;;  %v3317_v30 = vadd.f32 %v2503_v3, %v1931_v57 }
0x11f7   :  { %v1899_v24 = vmul.f32 %v2611_v10, %v1898_v22  ;;  %v1905_v25 = vmul.f32 %v2613_v54, %v1882_v12  ;;  %vm1911_vm14 = vweird.f32 %v2613_v54 }
0x11f8   :  { %2614 = vrsqrt.f32 %v1883_v23  ;;  %vm1912_vm0 = vmor %vm1910_vm15, %vm1911_vm14  ;;  %vm1920_vm2 = vweird.f32 %v1883_v23 }
0x11f9   :  { %v1903_v1 = vsel %vm1902_vm13, %v2611_v10, %v1899_v24  ;;  %v1906_v26 = vmul.f32 %v2613_v54, %v1905_v25 }
0x11fa   :  { %v1925_v27 = vmul.f32 %v1903_v1, %v3283_v38 }
0x11fb   :  { %v1907_v50 = vmul.f32 0.5, %v1906_v26 }
0x11fc   :  { %v1932_v28 = vmul.f32 %v2502_v61, %v1925_v27 }
0x11fd   :  { %v1908_v29 = vsub.f32 1.5, %v1907_v50 }
0x11fe   :  { %v2615_v2 = vpop.eup %2614  ;;  %v3319_v20 = vadd.f32 %v2503_v3, %v1932_v28 }
0x11ff   :  { %v1909_v32 = vmul.f32 %v2613_v54, %v1908_v29  ;;  %v1915_v33 = vmul.f32 %v2615_v2, %v1883_v23  ;;  %vm1921_vm1 = vweird.f32 %v2615_v2 }
0x1200   :  { %v1942_v21 = vpack.c.bf16 %v3319_v20, %v3317_v30  ;;  %vm1922_vm3 = vmor %vm1920_vm2, %vm1921_vm1  ;;  %vm2218_vm1 = vcmask 1042434   ;;  %vm2221_vm2 = vcmask 1043459  }
0x1201   :  { %v1916_v34 = vmul.f32 %v2615_v2, %v1915_v33  ;;  %v1913_v17 = vsel %vm1912_vm0, %v2613_v54, %v1909_v32  ;;  %vm2215_vm0 = vcmask 1041409  }
0x1202   :  { %2400 = vmatmul.msk.bf16.vlgmr.msra.gmra.mxu3 %vm192_vm6, %v1942_v21  ;;  %v1926_v48 = vmul.f32 %v1913_v17, %v3289_v63  ;;  %v2458_v63 = vld [vmem:[%s3420_s16 + $0x38] sm:$0xff] }
0x1203   :  { %v1917_v60 = vmul.f32 0.5, %v1916_v34  ;;  %2077 = vmatpush.bf16.msrb.mxu0 %v2458_v63 }
0x1204   :  { %v1933_v18 = vmul.f32 %v2502_v61, %v1926_v48 }
0x1205   :  { %v1918_v35 = vsub.f32 1.5, %v1917_v60 }
0x1206   :  { %v3326_v11 = vadd.f32 %v2503_v3, %v1933_v18 }
0x1207   :  { %v1919_v38 = vmul.f32 %v2615_v2, %v1918_v35  ;;  %2078 = vmatpush.bf16.msrb.mxu0 %v2457_v43  ;;  %v2505_v35 = vld [vmem:[%s3419_s17 + $0x1] ss:$0 sm:$0xff] }
0x1209   :  { %v1923_v41 = vsel %vm1922_vm3, %v2615_v2, %v1919_v38  ;;  %vm2224_vm3 = vcmask 257024  }
0x120a   :  { %v1927_v49 = vmul.f32 %v1923_v41, %v3295_v6  ;;  %v2456_v6 = vld [vmem:[%s3420_s16 + $0x28] sm:$0xff] }
0x120b   :  { %2079 = vmatpush.bf16.msrb.mxu0 %v2456_v6 }
0x120c   :  { %v1934_v42 = vmul.f32 %v2502_v61, %v1927_v49 }
0x120e   :  { %v3328_v46 = vadd.f32 %v2503_v3, %v1934_v42 }
0x120f   :  { %2080 = vmatpush.bf16.msrb.mxu0 %v2455_v52 }
0x1210   :  { %v1943_v14 = vpack.c.bf16 %v3328_v46, %v3326_v11 }
0x1212   :  { %2401 = vmatmul.msk.bf16.gmra.mxu3 %vm192_vm6, %v1943_v14 }
0x1285   :  { %v1981_v55 = vpop.f32.mrf.mxu3 }
0x1286   :  { %v1982_v58 = vadd.f32 %v2504_v51, %v1981_v55 }
0x1288   :  { %v1991_v36 = vmul.f32 %v1982_v58, %v1982_v58 }
0x128a   :  { %v1995_v59 = vmul.f32 %v1991_v36, %v1982_v58 }
0x128c   :  { %v1999_v37 = vmul.f32 0.044715, %v1995_v59 }
0x128d   :  { %v1983_v62 = vpop.f32.mrf.mxu3 }
0x128e   :  { %v2003_v0 = vadd.f32 %v1999_v37, %v1982_v58  ;;  %v1984_v31 = vadd.f32 %v2504_v51, %v1983_v62 }
0x1290   :  { %v2007_v53 = vmul.f32 0.7978846, %v2003_v0  ;;  %v1992_v4 = vmul.f32 %v1984_v31, %v1984_v31 }
0x1292   :  { %v1996_v40 = vmul.f32 %v1992_v4, %v1984_v31  ;;  %2616 = vtanh.f32 %v2007_v53 }
0x1294   :  { %v2000_v5 = vmul.f32 0.044715, %v1996_v40 }
0x1295   :  { %v1986_v45 = vpop.f32.mrf.mxu3 }
0x1296   :  { %v2004_v7 = vadd.f32 %v2000_v5, %v1984_v31  ;;  %v1987_v8 = vadd.f32 %v2504_v51, %v1986_v45 }
0x1298   :  { %v2008_v10 = vmul.f32 0.7978846, %v2004_v7  ;;  %v1993_v12 = vmul.f32 %v1987_v8, %v1987_v8  ;;  %v2617_v13 = vpop.eup %2616 }
0x1299   :  { %v2015_v19 = vadd.f32 1.0, %v2617_v13 }
0x129a   :  { %2618 = vtanh.f32 %v2008_v10  ;;  %v1997_v15 = vmul.f32 %v1993_v12, %v1987_v8 }
0x129b   :  { %v2019_v44 = vmul.f32 0.5, %v2015_v19 }
0x129c   :  { %v2001_v47 = vmul.f32 0.044715, %v1997_v15 }
0x129d   :  { %v1988_v9 = vpop.f32.mrf.mxu3  ;;  %v2023_v26 = vmul.f32 %v2019_v44, %v1982_v58 }
0x129e   :  { %v2005_v56 = vadd.f32 %v2001_v47, %v1987_v8  ;;  %v1989_v16 = vadd.f32 %v2504_v51, %v1988_v9 }
0x12a0   :  { %v2619_v22 = vpop.eup %2618  ;;  %v2009_v54 = vmul.f32 0.7978846, %v2005_v56  ;;  %v1994_v61 = vmul.f32 %v1989_v16, %v1989_v16 }
0x12a1   :  { %v2016_v23 = vadd.f32 1.0, %v2619_v22 }
0x12a2   :  { %v1998_v24 = vmul.f32 %v1994_v61, %v1989_v16  ;;  %2620 = vtanh.f32 %v2009_v54 }
0x12a3   :  { %v2020_v25 = vmul.f32 0.5, %v2016_v23 }
0x12a4   :  { %v2002_v1 = vmul.f32 0.044715, %v1998_v24 }
0x12a5   :  { %v2024_v3 = vmul.f32 %v2020_v25, %v1984_v31 }
0x12a6   :  { %v2006_v57 = vadd.f32 %v2002_v1, %v1989_v16 }
0x12a7   :  { %v2027_v27 = vpack.c.bf16 %v2024_v3, %v2023_v26 }
0x12a8   :  { %v2010_v50 = vmul.f32 0.7978846, %v2006_v57  ;;  %v2621_v28 = vpop.eup %2620 }
0x12a9   :  { %2427 = vmatmul.msk.bf16.vlgmr.msrb.gmra.mxu0 %vm1124_vm9, %v2027_v27  ;;  %v2017_v29 = vadd.f32 1.0, %v2621_v28 }
0x12aa   :  { %2622 = vtanh.f32 %v2010_v50 }
0x12ab   :  { %v2021_v33 = vmul.f32 0.5, %v2017_v29 }
0x12ad   :  { %v2025_v34 = vmul.f32 %v2021_v33, %v1987_v8 }
0x12b0   :  { %v2623_v2 = vpop.eup %2622 }
0x12b1   :  { %v2018_v32 = vadd.f32 1.0, %v2623_v2 }
0x12b3   :  { %v2022_v21 = vmul.f32 0.5, %v2018_v32 }
0x12b5   :  { %v2026_v17 = vmul.f32 %v2022_v21, %v1989_v16  ;;  %v27_v21 = vstv %s3424_s21 }
0x12b6   :  { %28 = vst [vmem:[#allocation2] sm:$0x1] %v27_v21 }
0x12b7   :  { %v2028_v60 = vpack.c.bf16 %v2026_v17, %v2025_v34 }
0x12b9   :  { %2428 = vmatmul.msk.bf16.gmra.mxu0 %vm1124_vm9, %v2028_v60 }
0x1326   :  { %v2082_v48 = vpop.f32.mrf.mxu0 }
0x1327   :  { %v2083_v38 = vadd.f32 %v2505_v35, %v2082_v48 }
0x1329   :  { %v2092_v41 = vadd.f32 %v2083_v38, %v3317_v30 }
0x132b   :  { %v2100_v49 = vsel %vm192_vm6, %v2092_v41, 0.0 }
0x132c   :  { %2101 = vadd.xlane.f32.xlu2 %v2100_v49 }
0x132e   :  { %v2084_v18 = vpop.f32.mrf.mxu0 }
0x132f   :  { %v2085_v42 = vadd.f32 %v2505_v35, %v2084_v18 }
0x1331   :  { %v2093_v14 = vadd.f32 %v2085_v42, %v3319_v20 }
0x1333   :  { %v2103_v63 = vsel %vm192_vm6, %v2093_v14, 0.0 }
0x1334   :  { %2104 = vadd.xlane.f32.xlu0 %v2103_v63  ;;  %v2506_v63 = vld [vmem:[%s3421_s18 + $0x1] ss:$0 sm:$0xff] }
0x1336   :  { %v2087_v43 = vpop.f32.mrf.mxu0 }
0x1337   :  { %v2088_v6 = vadd.f32 %v2505_v35, %v2087_v43 }
0x1339   :  { %v2094_v51 = vadd.f32 %v2088_v6, %v3326_v11 }
0x133b   :  { %v2106_v55 = vsel %vm192_vm6, %v2094_v51, 0.0 }
0x133c   :  { %2107 = vadd.xlane.f32.xlu1 %v2106_v55 }
0x133e   :  { %v2089_v52 = vpop.f32.mrf.mxu0 }
0x133f   :  { %v2090_v58 = vadd.f32 %v2505_v35, %v2089_v52 }
0x1341   :  { %v2095_v30 = vadd.f32 %v2090_v58, %v3328_v46 }
0x1343   :  { %v2109_v36 = vsel %vm192_vm6, %v2095_v30, 0.0 }
0x1344   :  { %2110 = vadd.xlane.f32.xlu0 %v2109_v36 }
0x139f   :  { %v2102_v59 = vpop.xlane.xlu2 %2101 }
0x13a0   :  { %v2112_v20 = vmul.f32 %v2102_v59, %v2799_v39  ;;  %v2507_v59 = vld [vmem:[%s3422_s19 + $0x1] ss:$0 sm:$0xff] }
0x13a2   :  { %v3362_v37 = vsub.f32 %v2092_v41, %v2112_v20 }
0x13a4   :  { %v2120_v62 = vmul.f32 %v3362_v37, %v3362_v37 }
0x13a6   :  { %v2124_v11 = vsel %vm192_vm6, %v2120_v62, 0.0 }
0x13a7   :  { %v2105_v0 = vpop.xlane.xlu0 %2104  ;;  %2125 = vadd.xlane.f32.xlu0 %v2124_v11 }
0x13a8   :  { %v2113_v31 = vmul.f32 %v2105_v0, %v2799_v39 }
0x13aa   :  { %v2117_v53 = vsub.f32 %v2093_v14, %v2113_v31 }
0x13ac   :  { %v2121_v4 = vmul.f32 %v2117_v53, %v2117_v53 }
0x13ae   :  { %v2127_v46 = vsel %vm192_vm6, %v2121_v4, 0.0 }
0x13af   :  { %v2108_v40 = vpop.xlane.xlu1 %2107  ;;  %2128 = vadd.xlane.f32.xlu1 %v2127_v46 }
0x13b0   :  { %v2114_v5 = vmul.f32 %v2108_v40, %v2799_v39 }
0x13b2   :  { %v3370_v45 = vsub.f32 %v2094_v51, %v2114_v5 }
0x13b4   :  { %v2122_v7 = vmul.f32 %v3370_v45, %v3370_v45 }
0x13b6   :  { %v2130_v8 = vsel %vm192_vm6, %v2122_v7, 0.0 }
0x13b7   :  { %v2111_v10 = vpop.xlane.xlu0 %2110  ;;  %2131 = vadd.xlane.f32.xlu2 %v2130_v8 }
0x13b8   :  { %v2115_v12 = vmul.f32 %v2111_v10, %v2799_v39 }
0x13ba   :  { %v3376_v13 = vsub.f32 %v2095_v30, %v2115_v12 }
0x13bc   :  { %v2123_v15 = vmul.f32 %v3376_v13, %v3376_v13 }
0x13be   :  { %v2133_v47 = vsel %vm192_vm6, %v2123_v15, 0.0 }
0x13bf   :  { %2134 = vadd.xlane.f32.xlu1 %v2133_v47 }
0x141a   :  { %v2126_v19 = vpop.xlane.xlu0 %2125 }
0x141b   :  { %v2136_v9 = vmul.f32 %v2126_v19, %v2799_v39 }
0x141d   :  { %v2140_v56 = vadd.f32 1e-05, %v2136_v9 }
0x141f   :  { %2624 = vrsqrt.f32 %v2140_v56  ;;  %vm2150_vm5 = vweird.f32 %v2140_v56 }
0x1422   :  { %v2129_v16 = vpop.xlane.xlu1 %2128 }
0x1423   :  { %v2137_v22 = vmul.f32 %v2129_v16, %v2799_v39 }
0x1425   :  { %v2141_v54 = vadd.f32 1e-05, %v2137_v22  ;;  %v2625_v61 = vpop.eup %2624 }
0x1426   :  { %v2145_v24 = vmul.f32 %v2625_v61, %v2140_v56  ;;  %vm2151_vm10 = vweird.f32 %v2625_v61 }
0x1427   :  { %2626 = vrsqrt.f32 %v2141_v54  ;;  %vm2160_vm9 = vweird.f32 %v2141_v54  ;;  %vm2152_vm8 = vmor %vm2150_vm5, %vm2151_vm10 }
0x1428   :  { %v2146_v3 = vmul.f32 %v2625_v61, %v2145_v24 }
0x142a   :  { %v2132_v44 = vpop.xlane.xlu2 %2131  ;;  %v2147_v29 = vmul.f32 0.5, %v2146_v3 }
0x142b   :  { %v2138_v23 = vmul.f32 %v2132_v44, %v2799_v39 }
0x142c   :  { %v2148_v60 = vsub.f32 1.5, %v2147_v29 }
0x142d   :  { %v2627_v25 = vpop.eup %2626  ;;  %v2142_v1 = vadd.f32 1e-05, %v2138_v23 }
0x142e   :  { %v2155_v26 = vmul.f32 %v2627_v25, %v2141_v54  ;;  %vm2161_vm6 = vweird.f32 %v2627_v25 }
0x142f   :  { %2628 = vrsqrt.f32 %v2142_v1  ;;  %vm2162_vm7 = vmor %vm2160_vm9, %vm2161_vm6  ;;  %vm2170_vm11 = vweird.f32 %v2142_v1  ;;  %vm2233_vm6 = vcmask 3072  }
0x1430   :  { %v2156_v57 = vmul.f32 %v2627_v25, %v2155_v26 }
0x1432   :  { %v2157_v27 = vmul.f32 0.5, %v2156_v57  ;;  %v2135_v50 = vpop.xlane.xlu1 %2134 }
0x1433   :  { %v2139_v28 = vmul.f32 %v2135_v50, %v2799_v39  ;;  %v2149_v39 = vmul.f32 %v2625_v61, %v2148_v60 }
0x1434   :  { %v2158_v2 = vsub.f32 1.5, %v2157_v27 }
0x1435   :  { %v2629_v32 = vpop.eup %2628  ;;  %v2143_v33 = vadd.f32 1e-05, %v2139_v28  ;;  %v2153_v43 = vsel %vm2152_vm8, %v2625_v61, %v2149_v39 }
0x1436   :  { %v2159_v34 = vmul.f32 %v2627_v25, %v2158_v2  ;;  %v2165_v17 = vmul.f32 %v2629_v32, %v2142_v1  ;;  %vm2171_vm4 = vweird.f32 %v2629_v32  ;;  %v2184_v30 = vmul.f32 %v2153_v43, %v3362_v37 }
0x1437   :  { %2630 = vrsqrt.f32 %v2143_v33  ;;  %vm2172_vm12 = vmor %vm2170_vm11, %vm2171_vm4  ;;  %vm2180_vm14 = vweird.f32 %v2143_v33 }
0x1438   :  { %v2166_v35 = vmul.f32 %v2629_v32, %v2165_v17  ;;  %v2163_v48 = vsel %vm2162_vm7, %v2627_v25, %v2159_v34  ;;  %v2191_v31 = vmul.f32 %v2506_v63, %v2184_v30 }
0x1439   :  { %v2185_v18 = vmul.f32 %v2163_v48, %v2117_v53  ;;  %v2508_v53 = vld [vmem:[%s3423_s20] ss:$0 sm:$0xff] }
0x143a   :  { %v2167_v38 = vmul.f32 0.5, %v2166_v35 }
0x143b   :  { %v2192_v55 = vmul.f32 %v2506_v63, %v2185_v18 }
0x143c   :  { %v2168_v41 = vsub.f32 1.5, %v2167_v38 }
0x143d   :  { %v2631_v49 = vpop.eup %2630  ;;  %v2199_v62 = vadd.f32 %v2507_v59, %v2192_v55 }
0x143e   :  { %v2169_v42 = vmul.f32 %v2629_v32, %v2168_v41  ;;  %v2175_v14 = vmul.f32 %v2631_v49, %v2143_v33  ;;  %vm2181_vm13 = vweird.f32 %v2631_v49 }
0x143f   :  { %vm2182_vm15 = vmor %vm2180_vm14, %vm2181_vm13  ;;  %v2207_v46 = vmul.f32 %v2508_v53, %v2199_v62 }
0x1440   :  { %v2173_v6 = vsel %vm2172_vm12, %v2629_v32, %v2169_v42  ;;  %v2176_v51 = vmul.f32 %v2631_v49, %v2175_v14 }
0x1441   :  { %v2186_v52 = vmul.f32 %v2173_v6, %v3370_v45  ;;  %v2198_v45 = vadd.f32 %v2507_v59, %v2191_v31  ;;  %v2214_v8 = vrot.slane %v2207_v46, 7 }
0x1442   :  { %v2177_v58 = vmul.f32 0.5, %v2176_v51 }
0x1443   :  { %v2193_v36 = vmul.f32 %v2506_v63, %v2186_v52  ;;  %v2206_v12 = vmul.f32 %v2508_v53, %v2198_v45 }
0x1444   :  { %v2178_v20 = vsub.f32 1.5, %v2177_v58 }
0x1445   :  { %v2200_v0 = vadd.f32 %v2507_v59, %v2193_v36  ;;  %v2216_v47 = vsel %vm2215_vm0, %v2214_v8, %v2206_v12 }
0x1446   :  { %v2179_v11 = vmul.f32 %v2631_v49, %v2178_v20 }
0x1447   :  { %v2208_v40 = vmul.f32 %v2508_v53, %v2200_v0 }
0x1448   :  { %v2183_v4 = vsel %vm2182_vm15, %v2631_v49, %v2179_v11 }
0x1449   :  { %v2187_v37 = vmul.f32 %v2183_v4, %v3376_v13  ;;  %v2217_v10 = vrot.slane %v2208_v40, 6  ;;  %v2509_v13 = vld [vmem:[#allocation2] ss:$0 sm:$0xff] }
0x144b   :  { %v2194_v5 = vmul.f32 %v2506_v63, %v2187_v37  ;;  %v2219_v9 = vsel %vm2218_vm1, %v2217_v10, %v2216_v47 }
0x144d   :  { %v2201_v7 = vadd.f32 %v2507_v59, %v2194_v5 }
0x144f   :  { %v2209_v15 = vmul.f32 %v2508_v53, %v2201_v7 }
0x1451   :  { %v2220_v19 = vrot.slane %v2209_v15, 5 }
0x1453   :  { %v2222_v56 = vsel %vm2221_vm2, %v2220_v19, %v2219_v9 }
0x1454   :  { %v2225_v16 = vsel %vm2224_vm3, %v2222_v56, 0.0 }
0x1455   :  { %2226 = vadd.xlane.f32.xlu2 %v2225_v16 }
0x14c8   :  { %v2227_v22 = vpop.xlane.xlu2 %2226 }
0x14c9   :  { %v2232_v54 = vadd.f32 %v2509_v13, %v2227_v22 }
0x14cb   :  { %2234 = vst.msk [vmem:[%s3425_s22] sm:$0xf] %vm2233_vm6, %v2232_v54 }

</bundles_post_ra>
